<compile_context>
chip_gen: v6e
topology: v6e:2x2x1
jax: 0.10.0
libtpu: 0.0.40
codegen_flags: <defaults>
</compile_context>

<pallas_src>
import functools

import jax
import jax.numpy as jnp
from jax.experimental import pallas as pl
from jax.experimental.pallas import tpu as pltpu

IN_DIM = 4            # input channels for the small test
RED_DIM = 128         # reduction_dim (kept small & lane-aligned for the test)
IMG_DIM = 256         # img_conv output channels (hard-coded 256 in the module)
RATES = (6, 12, 18)   # output_stride == 16 -> rates unchanged
PAD = max(RATES)      # single zero-pad big enough for every dilation rate
EPS = 1e-5
C_OUT = IMG_DIM + (1 + len(RATES)) * RED_DIM   # 768


def _aspp_kernel(pooled_ref, x_ref, cols_ref, w1_ref, w3_ref, sc_ref, bi_ref,
                 out_ref):
    """grid = (N,): each program computes every branch for one full image.

    Block shapes (H=W=16, Cin=4):
      pooled_ref : (1, 1, 256)       f32   image-pooling branch (BN+ReLU done)
      x_ref      : (1, HW, Cin)      bf16  flattened image rows
      cols_ref   : (3, 1, HW, 9*Cin) bf16  im2col slab per dilation rate
      w1_ref     : (Cin, R)          bf16
      w3_ref     : (3, 9*Cin, R)     bf16
      sc_ref     : (4, R)            f32   folded-BN scales (1x1, d6, d12, d18)
      bi_ref     : (4, R)            f32   folded-BN biases
      out_ref    : (1, HW, C_OUT)    f32
    """
    hw = x_ref.shape[1]

    # ---- image pooling branch: bilinear upsample of a 1x1 map == broadcast ----
    out_ref[0, :, 0:IMG_DIM] = jnp.broadcast_to(pooled_ref[0], (hw, IMG_DIM))

    # ---- 1x1 conv branch: single (HW, Cin) @ (Cin, R) MXU pass ----
    y1 = jnp.dot(x_ref[0], w1_ref[...], preferred_element_type=jnp.float32)
    y1 = jnp.maximum(y1 * sc_ref[0:1, :] + bi_ref[0:1, :], 0.0)
    out_ref[0, :, IMG_DIM:IMG_DIM + RED_DIM] = y1

    # ---- dilated 3x3 branches: one im2col matmul per rate ----
    for ri in range(len(RATES)):
        y = jnp.dot(cols_ref[ri, 0], w3_ref[ri],
                    preferred_element_type=jnp.float32)
        y = jnp.maximum(y * sc_ref[ri + 1:ri + 2, :] + bi_ref[ri + 1:ri + 2, :],
                        0.0)
        lo = IMG_DIM + (ri + 1) * RED_DIM
        out_ref[0, :, lo:lo + RED_DIM] = y


def aspp_forward(x_nchw, params):
    N, C, H, W = x_nchw.shape
    HW = H * W
    hp = jax.lax.Precision.HIGHEST

    x = jnp.transpose(x_nchw, (0, 2, 3, 1)).astype(jnp.float32)      # NHWC

    # -- image pooling branch hoisted out of the kernel (trivially cheap) --
    m = jnp.mean(x, axis=(1, 2))                                     # (N, Cin)
    pooled = jnp.maximum(
        jnp.dot(m, params["w_img"], precision=hp) * params["s_img"]
        + params["b_img"], 0.0)                                      # (N, 256)
    pooled = pooled.reshape(N, 1, IMG_DIM)

    # -- im2col pre-pack of the 9 dilated taps per rate (pure indexing glue) --
    xp = jnp.pad(x, ((0, 0), (PAD, PAD), (PAD, PAD), (0, 0)))
    cols = []
    for r in RATES:
        taps = [xp[:, PAD + (kh - 1) * r: PAD + (kh - 1) * r + H,
                   PAD + (kw - 1) * r: PAD + (kw - 1) * r + W, :]
                for kh in range(3) for kw in range(3)]
        cols.append(jnp.concatenate(taps, axis=-1).reshape(N, HW, 9 * C))
    cols = jnp.stack(cols, axis=0).astype(jnp.bfloat16)              # (3,N,HW,9C)

    x_flat = x.reshape(N, HW, C).astype(jnp.bfloat16)
    w1 = params["w1"].astype(jnp.bfloat16)
    w3 = params["w3"].reshape(len(RATES), 9 * C, RED_DIM).astype(jnp.bfloat16)

    out = pl.pallas_call(
        _aspp_kernel,
        out_shape=jax.ShapeDtypeStruct((N, HW, C_OUT), jnp.float32),
        grid_spec=pltpu.PrefetchScalarGridSpec(
            num_scalar_prefetch=0,
            grid=(N,),
            in_specs=[
                pl.BlockSpec((1, 1, IMG_DIM), lambda n: (n, 0, 0)),            # pooled
                pl.BlockSpec((1, HW, C), lambda n: (n, 0, 0)),                 # x rows
                pl.BlockSpec((len(RATES), 1, HW, 9 * C),
                             lambda n: (0, n, 0, 0)),                          # im2col slabs
                pl.BlockSpec((C, RED_DIM), lambda n: (0, 0)),                  # w 1x1
                pl.BlockSpec((len(RATES), 9 * C, RED_DIM),
                             lambda n: (0, 0, 0)),                             # w 3x3 (im2col)
                pl.BlockSpec((1 + len(RATES), RED_DIM), lambda n: (0, 0)),     # scales
                pl.BlockSpec((1 + len(RATES), RED_DIM), lambda n: (0, 0)),     # biases
            ],
            out_specs=pl.BlockSpec((1, HW, C_OUT), lambda n: (n, 0, 0)),
        ),
        compiler_params=pltpu.CompilerParams(
            dimension_semantics=("parallel",)),
    )(pooled, x_flat, cols, w1, w3, params["scales"], params["biases"])

    out = out.reshape(N, H, W, C_OUT)
    return jnp.transpose(out, (0, 3, 1, 2))                          # NCHW


def init_params(key, in_dim):
    """Deterministic synthetic parameters (conv weights + folded BatchNorm)."""
    keys = iter(jax.random.split(key, 32))

    def bn_fold(dim):
        gamma = jax.random.uniform(next(keys), (dim,), jnp.float32, 0.5, 1.5)
        beta = 0.05 * jax.random.normal(next(keys), (dim,), jnp.float32)
        mean = 0.05 * jax.random.normal(next(keys), (dim,), jnp.float32)
        var = jax.random.uniform(next(keys), (dim,), jnp.float32, 0.5, 1.5)
        scale = gamma * jax.lax.rsqrt(var + EPS)
        bias = beta - mean * scale
        return scale, bias

    w_img = 0.1 * jax.random.normal(next(keys), (in_dim, IMG_DIM), jnp.float32)
    w1 = 0.1 * jax.random.normal(next(keys), (in_dim, RED_DIM), jnp.float32)
    w3 = 0.1 * jax.random.normal(next(keys), (len(RATES), 3, 3, in_dim, RED_DIM),
                                 jnp.float32)

    s_img, b_img = bn_fold(IMG_DIM)
    scales, biases = [], []
    for _ in range(1 + len(RATES)):            # 1x1 branch + 3 dilated branches
        s, b = bn_fold(RED_DIM)
        scales.append(s)
        biases.append(b)

    return dict(
        w_img=w_img,
        s_img=s_img.reshape(1, IMG_DIM),
        b_img=b_img.reshape(1, IMG_DIM),
        w1=w1,
        w3=w3,
        scales=jnp.stack(scales),              # (4, RED_DIM)
        biases=jnp.stack(biases),              # (4, RED_DIM)
    )


def aspp_reference(x_nchw, params):
    """Pure-JAX f32 HIGHEST-precision reference (same math as the module)."""
    hp = jax.lax.Precision.HIGHEST
    x = jnp.transpose(x_nchw, (0, 2, 3, 1)).astype(jnp.float32)
    N, H, W, C = x.shape

    m = jnp.mean(x, axis=(1, 2))                                        # (N, C)
    yi = jnp.maximum(jnp.dot(m, params["w_img"], precision=hp)
                     * params["s_img"] + params["b_img"], 0.0)          # (N, 256)
    yi = jnp.broadcast_to(yi[:, None, None, :], (N, H, W, IMG_DIM))
    outs = [yi]

    y1 = jnp.maximum(jnp.einsum('nhwc,cd->nhwd', x, params["w1"], precision=hp)
                     * params["scales"][0] + params["biases"][0], 0.0)
    outs.append(y1)

    xp = jnp.pad(x, ((0, 0), (PAD, PAD), (PAD, PAD), (0, 0)))
    for ri, r in enumerate(RATES):
        acc = jnp.zeros((N, H, W, RED_DIM), jnp.float32)
        for kh in range(3):
            for kw in range(3):
                hs = PAD + (kh - 1) * r
                ws = PAD + (kw - 1) * r
                xs = xp[:, hs:hs + H, ws:ws + W, :]
                acc = acc + jnp.einsum('nhwc,cd->nhwd', xs,
                                       params["w3"][ri, kh, kw], precision=hp)
        outs.append(jnp.maximum(acc * params["scales"][ri + 1]
                                + params["biases"][ri + 1], 0.0))
    out = jnp.concatenate(outs, axis=-1)
    return jnp.transpose(out, (0, 3, 1, 2))


if __name__ == "__main__":
    key = jax.random.PRNGKey(0)
    kx, kp = jax.random.split(key)
    x = jax.random.normal(kx, (2, IN_DIM, 16, 16), jnp.float32)   # NCHW like torch
    params = init_params(kp, IN_DIM)

    fwd = jax.jit(aspp_forward)
    out = jax.block_until_ready(fwd(x, params))
    ref = jax.block_until_ready(aspp_reference(x, params))

    assert out.shape == (2, C_OUT, 16, 16), out.shape
    # bf16 MXU inputs vs f32-HIGHEST reference -> slightly wider tolerance.
    err = float(jnp.max(jnp.abs(out - ref)))
    assert err < 3e-2, f"max abs err {err}"
    print("KERNEL_OK")
</pallas_src>

<mosaic_0001>
module attributes {stable_mosaic.version = 11 : i64} {
  func.func @_aspp_kernel(%arg0: i32, %arg1: memref<1x1x256xf32, #tpu.memory_space<vmem>>, %arg2: memref<1x256x4xbf16, #tpu.memory_space<vmem>>, %arg3: memref<3x1x256x36xbf16, #tpu.memory_space<vmem>>, %arg4: memref<4x128xbf16, #tpu.memory_space<vmem>>, %arg5: memref<3x36x128xbf16, #tpu.memory_space<vmem>>, %arg6: memref<4x128xf32, #tpu.memory_space<vmem>>, %arg7: memref<4x128xf32, #tpu.memory_space<vmem>>, %arg8: memref<1x256x768xf32, #tpu.memory_space<vmem>>) attributes {dimension_semantics = [#tpu.dimension_semantics<parallel>], iteration_bounds = array<i64: 2>, scalar_prefetch = 0 : i64, scratch_operands = 0 : i64, tpu.core_type = #tpu.core_type<tc>, window_params = [{transform_indices = @transform_0, window_bounds = array<i64: 1, 1, 256>}, {transform_indices = @transform_1, window_bounds = array<i64: 1, 256, 4>}, {transform_indices = @transform_2, window_bounds = array<i64: 3, 1, 256, 36>}, {pipeline_mode = #tpu.pipeline_mode<synchronous>, transform_indices = @transform_3, window_bounds = array<i64: 4, 128>}, {pipeline_mode = #tpu.pipeline_mode<synchronous>, transform_indices = @transform_4, window_bounds = array<i64: 3, 36, 128>}, {pipeline_mode = #tpu.pipeline_mode<synchronous>, transform_indices = @transform_5, window_bounds = array<i64: 4, 128>}, {pipeline_mode = #tpu.pipeline_mode<synchronous>, transform_indices = @transform_6, window_bounds = array<i64: 4, 128>}, {transform_indices = @transform_7, window_bounds = array<i64: 1, 256, 768>}]} {
    %c0 = arith.constant 0 : index
    %c0_0 = arith.constant 0 : index
    %c0_1 = arith.constant 0 : index
    %0 = vector.load %arg1[%c0, %c0_0, %c0_1] : memref<1x1x256xf32, #tpu.memory_space<vmem>>, vector<1x1x256xf32>
    %1 = vector.shape_cast %0 : vector<1x1x256xf32> to vector<1x256xf32>
    %2 = vector.shape_cast %1 : vector<1x256xf32> to vector<1x256xf32>
    %3 = vector.broadcast %2 : vector<1x256xf32> to vector<256x256xf32>
    %c0_2 = arith.constant 0 : index
    %c0_3 = arith.constant 0 : index
    %c0_4 = arith.constant 0 : index
    %4 = vector.load %arg8[%c0_2, %c0_3, %c0_4] : memref<1x256x768xf32, #tpu.memory_space<vmem>>, vector<1x256x256xf32>
    %5 = vector.shape_cast %4 : vector<1x256x256xf32> to vector<256x256xf32>
    %6 = vector.shape_cast %3 : vector<256x256xf32> to vector<1x256x256xf32>
    tpu.vector_store %arg8[%c0_2, %c0_3, %c0_4], %6 {strides = array<i32>} : memref<1x256x768xf32, #tpu.memory_space<vmem>>, vector<1x256x256xf32>,
    %c0_5 = arith.constant 0 : index
    %c0_6 = arith.constant 0 : index
    %c0_7 = arith.constant 0 : index
    %7 = vector.load %arg2[%c0_5, %c0_6, %c0_7] : memref<1x256x4xbf16, #tpu.memory_space<vmem>>, vector<1x256x4xbf16>
    %8 = vector.shape_cast %7 : vector<1x256x4xbf16> to vector<256x4xbf16>
    %c0_8 = arith.constant 0 : index
    %c0_9 = arith.constant 0 : index
    %9 = vector.load %arg4[%c0_8, %c0_9] : memref<4x128xbf16, #tpu.memory_space<vmem>>, vector<4x128xbf16>
    %cst = arith.constant dense<0.000000e+00> : vector<256x128xf32>
    %10 = tpu.matmul %8, %9, %cst {dimension_numbers = #tpu.dot_dimension_numbers<[1], [0], [0], [1], [0, 0, 1, 1], [], []>} : vector<256x4xbf16>, vector<4x128xbf16>, vector<256x128xf32> -> vector<256x128xf32>
    %c0_10 = arith.constant 0 : index
    %c0_11 = arith.constant 0 : index
    %11 = vector.load %arg6[%c0_10, %c0_11] : memref<4x128xf32, #tpu.memory_space<vmem>>, vector<1x128xf32>
    %12 = vector.broadcast %11 : vector<1x128xf32> to vector<256x128xf32>
    %13 = arith.mulf %10, %12 : vector<256x128xf32>
    %c0_12 = arith.constant 0 : index
    %c0_13 = arith.constant 0 : index
    %14 = vector.load %arg7[%c0_12, %c0_13] : memref<4x128xf32, #tpu.memory_space<vmem>>, vector<1x128xf32>
    %15 = vector.broadcast %14 : vector<1x128xf32> to vector<256x128xf32>
    %16 = arith.addf %13, %15 : vector<256x128xf32>
    %cst_14 = arith.constant 0.000000e+00 : f32
    %17 = vector.broadcast %cst_14 : f32 to vector<256x128xf32>
    %18 = arith.maximumf %16, %17 : vector<256x128xf32>
    %c0_15 = arith.constant 0 : index
    %c0_16 = arith.constant 0 : index
    %c256 = arith.constant 256 : index
    %19 = vector.load %arg8[%c0_15, %c0_16, %c256] : memref<1x256x768xf32, #tpu.memory_space<vmem>>, vector<1x256x128xf32>
    %20 = vector.shape_cast %19 : vector<1x256x128xf32> to vector<256x128xf32>
    %21 = vector.shape_cast %18 : vector<256x128xf32> to vector<1x256x128xf32>
    tpu.vector_store %arg8[%c0_15, %c0_16, %c256], %21 {strides = array<i32>} : memref<1x256x768xf32, #tpu.memory_space<vmem>>, vector<1x256x128xf32>,
    %c0_17 = arith.constant 0 : index
    %c0_18 = arith.constant 0 : index
    %c0_19 = arith.constant 0 : index
    %c0_20 = arith.constant 0 : index
    %22 = vector.load %arg3[%c0_17, %c0_18, %c0_19, %c0_20] : memref<3x1x256x36xbf16, #tpu.memory_space<vmem>>, vector<1x1x256x36xbf16>
    %23 = vector.shape_cast %22 : vector<1x1x256x36xbf16> to vector<256x36xbf16>
    %c0_21 = arith.constant 0 : index
    %c0_22 = arith.constant 0 : index
    %c0_23 = arith.constant 0 : index
    %24 = vector.load %arg5[%c0_21, %c0_22, %c0_23] : memref<3x36x128xbf16, #tpu.memory_space<vmem>>, vector<1x36x128xbf16>
    %25 = vector.shape_cast %24 : vector<1x36x128xbf16> to vector<36x128xbf16>
    %cst_24 = arith.constant dense<0.000000e+00> : vector<256x128xf32>
    %26 = tpu.matmul %23, %25, %cst_24 {dimension_numbers = #tpu.dot_dimension_numbers<[1], [0], [0], [1], [0, 0, 1, 1], [], []>} : vector<256x36xbf16>, vector<36x128xbf16>, vector<256x128xf32> -> vector<256x128xf32>
    %c1 = arith.constant 1 : index
    %c0_25 = arith.constant 0 : index
    %27 = vector.load %arg6[%c1, %c0_25] : memref<4x128xf32, #tpu.memory_space<vmem>>, vector<1x128xf32>
    %28 = vector.broadcast %27 : vector<1x128xf32> to vector<256x128xf32>
    %29 = arith.mulf %26, %28 : vector<256x128xf32>
    %c1_26 = arith.constant 1 : index
    %c0_27 = arith.constant 0 : index
    %30 = vector.load %arg7[%c1_26, %c0_27] : memref<4x128xf32, #tpu.memory_space<vmem>>, vector<1x128xf32>
    %31 = vector.broadcast %30 : vector<1x128xf32> to vector<256x128xf32>
    %32 = arith.addf %29, %31 : vector<256x128xf32>
    %cst_28 = arith.constant 0.000000e+00 : f32
    %33 = vector.broadcast %cst_28 : f32 to vector<256x128xf32>
    %34 = arith.maximumf %32, %33 : vector<256x128xf32>
    %c0_29 = arith.constant 0 : index
    %c0_30 = arith.constant 0 : index
    %c384 = arith.constant 384 : index
    %35 = vector.load %arg8[%c0_29, %c0_30, %c384] : memref<1x256x768xf32, #tpu.memory_space<vmem>>, vector<1x256x128xf32>
    %36 = vector.shape_cast %35 : vector<1x256x128xf32> to vector<256x128xf32>
    %37 = vector.shape_cast %34 : vector<256x128xf32> to vector<1x256x128xf32>
    tpu.vector_store %arg8[%c0_29, %c0_30, %c384], %37 {strides = array<i32>} : memref<1x256x768xf32, #tpu.memory_space<vmem>>, vector<1x256x128xf32>,
    %c1_31 = arith.constant 1 : index
    %c0_32 = arith.constant 0 : index
    %c0_33 = arith.constant 0 : index
    %c0_34 = arith.constant 0 : index
    %38 = vector.load %arg3[%c1_31, %c0_32, %c0_33, %c0_34] : memref<3x1x256x36xbf16, #tpu.memory_space<vmem>>, vector<1x1x256x36xbf16>
    %39 = vector.shape_cast %38 : vector<1x1x256x36xbf16> to vector<256x36xbf16>
    %c1_35 = arith.constant 1 : index
    %c0_36 = arith.constant 0 : index
    %c0_37 = arith.constant 0 : index
    %40 = vector.load %arg5[%c1_35, %c0_36, %c0_37] : memref<3x36x128xbf16, #tpu.memory_space<vmem>>, vector<1x36x128xbf16>
    %41 = vector.shape_cast %40 : vector<1x36x128xbf16> to vector<36x128xbf16>
    %cst_38 = arith.constant dense<0.000000e+00> : vector<256x128xf32>
    %42 = tpu.matmul %39, %41, %cst_38 {dimension_numbers = #tpu.dot_dimension_numbers<[1], [0], [0], [1], [0, 0, 1, 1], [], []>} : vector<256x36xbf16>, vector<36x128xbf16>, vector<256x128xf32> -> vector<256x128xf32>
    %c2 = arith.constant 2 : index
    %c0_39 = arith.constant 0 : index
    %43 = vector.load %arg6[%c2, %c0_39] : memref<4x128xf32, #tpu.memory_space<vmem>>, vector<1x128xf32>
    %44 = vector.broadcast %43 : vector<1x128xf32> to vector<256x128xf32>
    %45 = arith.mulf %42, %44 : vector<256x128xf32>
    %c2_40 = arith.constant 2 : index
    %c0_41 = arith.constant 0 : index
    %46 = vector.load %arg7[%c2_40, %c0_41] : memref<4x128xf32, #tpu.memory_space<vmem>>, vector<1x128xf32>
    %47 = vector.broadcast %46 : vector<1x128xf32> to vector<256x128xf32>
    %48 = arith.addf %45, %47 : vector<256x128xf32>
    %cst_42 = arith.constant 0.000000e+00 : f32
    %49 = vector.broadcast %cst_42 : f32 to vector<256x128xf32>
    %50 = arith.maximumf %48, %49 : vector<256x128xf32>
    %c0_43 = arith.constant 0 : index
    %c0_44 = arith.constant 0 : index
    %c512 = arith.constant 512 : index
    %51 = vector.load %arg8[%c0_43, %c0_44, %c512] : memref<1x256x768xf32, #tpu.memory_space<vmem>>, vector<1x256x128xf32>
    %52 = vector.shape_cast %51 : vector<1x256x128xf32> to vector<256x128xf32>
    %53 = vector.shape_cast %50 : vector<256x128xf32> to vector<1x256x128xf32>
    tpu.vector_store %arg8[%c0_43, %c0_44, %c512], %53 {strides = array<i32>} : memref<1x256x768xf32, #tpu.memory_space<vmem>>, vector<1x256x128xf32>,
    %c2_45 = arith.constant 2 : index
    %c0_46 = arith.constant 0 : index
    %c0_47 = arith.constant 0 : index
    %c0_48 = arith.constant 0 : index
    %54 = vector.load %arg3[%c2_45, %c0_46, %c0_47, %c0_48] : memref<3x1x256x36xbf16, #tpu.memory_space<vmem>>, vector<1x1x256x36xbf16>
    %55 = vector.shape_cast %54 : vector<1x1x256x36xbf16> to vector<256x36xbf16>
    %c2_49 = arith.constant 2 : index
    %c0_50 = arith.constant 0 : index
    %c0_51 = arith.constant 0 : index
    %56 = vector.load %arg5[%c2_49, %c0_50, %c0_51] : memref<3x36x128xbf16, #tpu.memory_space<vmem>>, vector<1x36x128xbf16>
    %57 = vector.shape_cast %56 : vector<1x36x128xbf16> to vector<36x128xbf16>
    %cst_52 = arith.constant dense<0.000000e+00> : vector<256x128xf32>
    %58 = tpu.matmul %55, %57, %cst_52 {dimension_numbers = #tpu.dot_dimension_numbers<[1], [0], [0], [1], [0, 0, 1, 1], [], []>} : vector<256x36xbf16>, vector<36x128xbf16>, vector<256x128xf32> -> vector<256x128xf32>
    %c3 = arith.constant 3 : index
    %c0_53 = arith.constant 0 : index
    %59 = vector.load %arg6[%c3, %c0_53] : memref<4x128xf32, #tpu.memory_space<vmem>>, vector<1x128xf32>
    %60 = vector.broadcast %59 : vector<1x128xf32> to vector<256x128xf32>
    %61 = arith.mulf %58, %60 : vector<256x128xf32>
    %c3_54 = arith.constant 3 : index
    %c0_55 = arith.constant 0 : index
    %62 = vector.load %arg7[%c3_54, %c0_55] : memref<4x128xf32, #tpu.memory_space<vmem>>, vector<1x128xf32>
    %63 = vector.broadcast %62 : vector<1x128xf32> to vector<256x128xf32>
    %64 = arith.addf %61, %63 : vector<256x128xf32>
    %cst_56 = arith.constant 0.000000e+00 : f32
    %65 = vector.broadcast %cst_56 : f32 to vector<256x128xf32>
    %66 = arith.maximumf %64, %65 : vector<256x128xf32>
    %c0_57 = arith.constant 0 : index
    %c0_58 = arith.constant 0 : index
    %c640 = arith.constant 640 : index
    %67 = vector.load %arg8[%c0_57, %c0_58, %c640] : memref<1x256x768xf32, #tpu.memory_space<vmem>>, vector<1x256x128xf32>
    %68 = vector.shape_cast %67 : vector<1x256x128xf32> to vector<256x128xf32>
    %69 = vector.shape_cast %66 : vector<256x128xf32> to vector<1x256x128xf32>
    tpu.vector_store %arg8[%c0_57, %c0_58, %c640], %69 {strides = array<i32>} : memref<1x256x768xf32, #tpu.memory_space<vmem>>, vector<1x256x128xf32>,
    return
  }
  func.func @transform_0(%arg0: i32) -> (i32, i32, i32) {
    %c0_i32 = arith.constant 0 : i32
    %c0_i32_0 = arith.constant 0 : i32
    %c0_i32_1 = arith.constant 0 : i32
    return %arg0, %c0_i32, %c0_i32_0 : i32, i32, i32
  }
  func.func @transform_1(%arg0: i32) -> (i32, i32, i32) {
    %c0_i32 = arith.constant 0 : i32
    %c0_i32_0 = arith.constant 0 : i32
    %c0_i32_1 = arith.constant 0 : i32
    return %arg0, %c0_i32, %c0_i32_0 : i32, i32, i32
  }
  func.func @transform_2(%arg0: i32) -> (i32, i32, i32, i32) {
    %c0_i32 = arith.constant 0 : i32
    %c0_i32_0 = arith.constant 0 : i32
    %c0_i32_1 = arith.constant 0 : i32
    %c0_i32_2 = arith.constant 0 : i32
    return %c0_i32, %arg0, %c0_i32_0, %c0_i32_1 : i32, i32, i32, i32
  }
  func.func @transform_3(%arg0: i32) -> (i32, i32) {
    %c0_i32 = arith.constant 0 : i32
    %c0_i32_0 = arith.constant 0 : i32
    %c0_i32_1 = arith.constant 0 : i32
    return %c0_i32, %c0_i32_0 : i32, i32
  }
  func.func @transform_4(%arg0: i32) -> (i32, i32, i32) {
    %c0_i32 = arith.constant 0 : i32
    %c0_i32_0 = arith.constant 0 : i32
    %c0_i32_1 = arith.constant 0 : i32
    %c0_i32_2 = arith.constant 0 : i32
    return %c0_i32, %c0_i32_0, %c0_i32_1 : i32, i32, i32
  }
  func.func @transform_5(%arg0: i32) -> (i32, i32) {
    %c0_i32 = arith.constant 0 : i32
    %c0_i32_0 = arith.constant 0 : i32
    %c0_i32_1 = arith.constant 0 : i32
    return %c0_i32, %c0_i32_0 : i32, i32
  }
  func.func @transform_6(%arg0: i32) -> (i32, i32) {
    %c0_i32 = arith.constant 0 : i32
    %c0_i32_0 = arith.constant 0 : i32
    %c0_i32_1 = arith.constant 0 : i32
    return %c0_i32, %c0_i32_0 : i32, i32
  }
  func.func @transform_7(%arg0: i32) -> (i32, i32, i32) {
    %c0_i32 = arith.constant 0 : i32
    %c0_i32_0 = arith.constant 0 : i32
    %c0_i32_1 = arith.constant 0 : i32
    return %arg0, %c0_i32, %c0_i32_0 : i32, i32, i32
  }
}

</mosaic_0001>

<bundles_post_ra>
// kernel: aspp_forward.1
= control target key start
LH: loop header
LB: loop body
LE: loop exit
PB: predicated region body
PF: predicated region fallthrough
CT: control target
= control target key end

     0   :  { %12 = vsyncpa [#allocation4], 0  ;;  %s4480_s0 = inlined_call_operand.vmem [shape: f32[2,1,256], index: 0, kind: input, shape index: {}]   ;;  %s4481_s1 = inlined_call_operand.vmem [shape: bf16[2,256,4], index: 1, kind: input, shape index: {}]   ;;  %s4482_s2 = inlined_call_operand.vmem [shape: bf16[3,2,256,36], index: 2, kind: input, shape index: {}]   ;;  %s4483_s3 = inlined_call_operand.vmem [shape: bf16[4,128], index: 3, kind: input, shape index: {}]   ;;  %s4484_s4 = inlined_call_operand.vmem [shape: bf16[3,36,128], index: 4, kind: input, shape index: {}]   ;;  %s4485_s5 = inlined_call_operand.vmem [shape: f32[4,128], index: 5, kind: input, shape index: {}]   ;;  %s4486_s6 = inlined_call_operand.vmem [shape: f32[4,128], index: 6, kind: input, shape index: {}]   ;;  %s4487_s7 = inlined_call_operand.hbm [shape: f32[2,256,768], index: 7, kind: output, shape index: {}]  }
   0x1   :  { %14 = vsyncpa [#allocation4 + $0x1], 0  ;;  %s3519_s24 = smov 0   ;;  %s3521_s25 = smov 0  }
   0x2   :  { %s3523_s26 = smov 0   ;;  %s3525_s27 = smov 0  }
   0x3 LB: > { %s3540_s28 = sadd.s32 4294967295, %s3474_s27   ;;  %s2837_s29 = sadd.s32 4294967294, %s3474_s27   ;;  %s3474_s27 = sphi %s3525_s27, %s4493_s27   ;;  %s3470_s26 = sphi %s3523_s26, %s4492_s26   ;;  %s3466_s25 = sphi %s3521_s25, %s4491_s25   ;;  %s3462_s24 = sphi %s3519_s24, %s4490_s24  }
   0x4   : > { %s3544_s30 = sadd.s32 1, %s3474_s27   ;;  %s79_s8 = sadd.s32 1, %s3470_s26 }
   0x5   : > { %s76_s9 = ssub.s32 %s3474_s27, %s3544_s30  ;;  %p86_p0 = scmp.ne.s32.totalorder %s3470_s26, %s3466_s25 }
   0x6   : > { %p77_p1 = scmp.eq.s32.totalorder %s76_s9, 0  ;;  %p87_p2 = scmp.eq.s32.totalorder %s3474_s27, 0 }
   0x7   : > { %p200_p3 = scmp.eq.s32.totalorder %s3540_s28, 1  ;;  %p205_p4 = scmp.ne.s32.totalorder %s3466_s25, %s3462_s24 }
   0x8   : > { %s3556_s10 = scalar_select %p77_p1, %s3470_s26, %s79_s8  }
   0x9   : > { %p88_p5 = por %p87_p2, %p86_p0  ;;  %p3558_p6 = por %p200_p3, %p86_p0 }
   0xa   : > { %p206_p7 = scmp.eq.s32.totalorder %s2837_s29, 1  ;;  %p2839_p9 = scmp.ge.s32.totalorder %s3474_s27, 2 }
   0xc   : > { %p3562_p8 = por %p206_p7, %p205_p4  ;;  %234 = sbr.rel (%p2839_p9) target bundleno = 46 (0x2e), region = 32 }
  0x11   : > { %252 = sbr.rel (!%p88_p5) target bundleno = 46 (0x2e), region = 44  ;;  %s254_s13 = sand.u32 (%p88_p5), 1, %s3470_s26  }
  0x12   : > { %s3068_s14 = sshll.u32 (%p88_p5), %s3474_s27, 7  ;;  %s3296_s15 = smul.u32 (%p88_p5), 384, %s254_s13 }
  0x13   : > { %s3574_s18 = scalar_lea.vmem (%p88_p5), %s4482_s2, %s3068_s14 }
  0x14   : > { %v276_v0 = vld [vmem:[%s3574_s18] sm:$0xff] (%p88_p5)   ;;  %v280_v1 = vld [vmem:[%s3574_s18 + $0x8] sm:$0xff] (%p88_p5)   ;;  %v284_v2 = vld [vmem:[%s3574_s18 + $0x10] sm:$0xff] (%p88_p5)   ;;  %s3582_s19 = scalar_lea.vmem (%p88_p5), [#allocation2], %s3296_s15 }
  0x15   : > { %v288_v3 = vld [vmem:[%s3574_s18 + $0x18] sm:$0xff] (%p88_p5)   ;;  %v292_v4 = vld [vmem:[%s3574_s18 + $0x20] sm:$0xff] (%p88_p5)   ;;  %v296_v5 = vld [vmem:[%s3574_s18 + $0x28] sm:$0xff] (%p88_p5)   ;;  %277 = vst [vmem:[%s3582_s19] sm:$0xff] (%p88_p5), %v276_v0  }
  0x16   : > { %281 = vst [vmem:[%s3582_s19 + $0x8] sm:$0xff] %v280_v1   ;;  %285 = vst [vmem:[%s3582_s19 + $0x10] sm:$0xff] %v284_v2   ;;  %v300_v6 = vld [vmem:[%s3574_s18 + $0x30] sm:$0xff]   ;;  %v304_v7 = vld [vmem:[%s3574_s18 + $0x38] sm:$0xff]  }
  0x17   : > { %289 = vst [vmem:[%s3582_s19 + $0x18] sm:$0xff] %v288_v3   ;;  %293 = vst [vmem:[%s3582_s19 + $0x20] sm:$0xff] %v292_v4   ;;  %v308_v8 = vld [vmem:[%s3574_s18 + $0x40] sm:$0xff]   ;;  %v312_v9 = vld [vmem:[%s3574_s18 + $0x48] sm:$0xff]  }
  0x18   : > { %297 = vst [vmem:[%s3582_s19 + $0x28] sm:$0xff] %v296_v5   ;;  %301 = vst [vmem:[%s3582_s19 + $0x30] sm:$0xff] %v300_v6   ;;  %v316_v10 = vld [vmem:[%s3574_s18 + $0x50] sm:$0xff]   ;;  %v320_v11 = vld [vmem:[%s3574_s18 + $0x58] sm:$0xff]  }
  0x19   : > { %305 = vst [vmem:[%s3582_s19 + $0x38] sm:$0xff] %v304_v7   ;;  %309 = vst [vmem:[%s3582_s19 + $0x40] sm:$0xff] %v308_v8   ;;  %v324_v12 = vld [vmem:[%s3574_s18 + $0x60] sm:$0xff]   ;;  %v328_v13 = vld [vmem:[%s3574_s18 + $0x68] sm:$0xff]  }
  0x1a   : > { %313 = vst [vmem:[%s3582_s19 + $0x48] sm:$0xff] %v312_v9   ;;  %317 = vst [vmem:[%s3582_s19 + $0x50] sm:$0xff] %v316_v10   ;;  %v332_v14 = vld [vmem:[%s3574_s18 + $0x70] sm:$0xff]   ;;  %v336_v15 = vld [vmem:[%s3574_s18 + $0x78] sm:$0xff]  }
  0x1b   : > { %321 = vst [vmem:[%s3582_s19 + $0x58] sm:$0xff] %v320_v11   ;;  %325 = vst [vmem:[%s3582_s19 + $0x60] sm:$0xff] %v324_v12   ;;  %v340_v16 = vld [vmem:[%s3574_s18 + $0x100] sm:$0xff]   ;;  %v344_v17 = vld [vmem:[%s3574_s18 + $0x108] sm:$0xff]  }
  0x1c   : > { %329 = vst [vmem:[%s3582_s19 + $0x68] sm:$0xff] %v328_v13   ;;  %333 = vst [vmem:[%s3582_s19 + $0x70] sm:$0xff] %v332_v14   ;;  %v348_v18 = vld [vmem:[%s3574_s18 + $0x110] sm:$0xff]   ;;  %v352_v19 = vld [vmem:[%s3574_s18 + $0x118] sm:$0xff]  }
  0x1d   : > { %337 = vst [vmem:[%s3582_s19 + $0x78] sm:$0xff] %v336_v15   ;;  %341 = vst [vmem:[%s3582_s19 + $0x80] sm:$0xff] %v340_v16   ;;  %v356_v20 = vld [vmem:[%s3574_s18 + $0x120] sm:$0xff]   ;;  %v360_v21 = vld [vmem:[%s3574_s18 + $0x128] sm:$0xff]  }
  0x1e   : > { %345 = vst [vmem:[%s3582_s19 + $0x88] sm:$0xff] %v344_v17   ;;  %349 = vst [vmem:[%s3582_s19 + $0x90] sm:$0xff] %v348_v18   ;;  %v364_v22 = vld [vmem:[%s3574_s18 + $0x130] sm:$0xff]   ;;  %v368_v23 = vld [vmem:[%s3574_s18 + $0x138] sm:$0xff]  }
  0x1f   : > { %353 = vst [vmem:[%s3582_s19 + $0x98] sm:$0xff] %v352_v19   ;;  %357 = vst [vmem:[%s3582_s19 + $0xa0] sm:$0xff] %v356_v20   ;;  %v372_v24 = vld [vmem:[%s3574_s18 + $0x140] sm:$0xff]   ;;  %v376_v25 = vld [vmem:[%s3574_s18 + $0x148] sm:$0xff]  }
  0x20   : > { %361 = vst [vmem:[%s3582_s19 + $0xa8] sm:$0xff] %v360_v21   ;;  %365 = vst [vmem:[%s3582_s19 + $0xb0] sm:$0xff] %v364_v22   ;;  %v380_v26 = vld [vmem:[%s3574_s18 + $0x150] sm:$0xff]   ;;  %v384_v27 = vld [vmem:[%s3574_s18 + $0x158] sm:$0xff]  }
  0x21   : > { %369 = vst [vmem:[%s3582_s19 + $0xb8] sm:$0xff] %v368_v23   ;;  %373 = vst [vmem:[%s3582_s19 + $0xc0] sm:$0xff] %v372_v24   ;;  %v388_v28 = vld [vmem:[%s3574_s18 + $0x160] sm:$0xff]   ;;  %v392_v29 = vld [vmem:[%s3574_s18 + $0x168] sm:$0xff]  }
  0x22   : > { %377 = vst [vmem:[%s3582_s19 + $0xc8] sm:$0xff] %v376_v25   ;;  %381 = vst [vmem:[%s3582_s19 + $0xd0] sm:$0xff] %v380_v26   ;;  %v396_v30 = vld [vmem:[%s3574_s18 + $0x170] sm:$0xff]   ;;  %v400_v31 = vld [vmem:[%s3574_s18 + $0x178] sm:$0xff]  }
  0x23   : > { %385 = vst [vmem:[%s3582_s19 + $0xd8] sm:$0xff] %v384_v27   ;;  %389 = vst [vmem:[%s3582_s19 + $0xe0] sm:$0xff] %v388_v28   ;;  %v404_v32 = vld [vmem:[%s3574_s18 + $0x200] sm:$0xff]   ;;  %v408_v33 = vld [vmem:[%s3574_s18 + $0x208] sm:$0xff]  }
  0x24   : > { %393 = vst [vmem:[%s3582_s19 + $0xe8] sm:$0xff] %v392_v29   ;;  %397 = vst [vmem:[%s3582_s19 + $0xf0] sm:$0xff] %v396_v30   ;;  %v412_v34 = vld [vmem:[%s3574_s18 + $0x210] sm:$0xff]   ;;  %v416_v35 = vld [vmem:[%s3574_s18 + $0x218] sm:$0xff]  }
  0x25   : > { %401 = vst [vmem:[%s3582_s19 + $0xf8] sm:$0xff] %v400_v31   ;;  %405 = vst [vmem:[%s3582_s19 + $0x100] sm:$0xff] %v404_v32   ;;  %v420_v36 = vld [vmem:[%s3574_s18 + $0x220] sm:$0xff]   ;;  %v424_v37 = vld [vmem:[%s3574_s18 + $0x228] sm:$0xff]  }
  0x26   : > { %409 = vst [vmem:[%s3582_s19 + $0x108] sm:$0xff] %v408_v33   ;;  %413 = vst [vmem:[%s3582_s19 + $0x110] sm:$0xff] %v412_v34   ;;  %v428_v38 = vld [vmem:[%s3574_s18 + $0x230] sm:$0xff]   ;;  %v432_v39 = vld [vmem:[%s3574_s18 + $0x238] sm:$0xff]  }
  0x27   : > { %417 = vst [vmem:[%s3582_s19 + $0x118] sm:$0xff] %v416_v35   ;;  %421 = vst [vmem:[%s3582_s19 + $0x120] sm:$0xff] %v420_v36   ;;  %v436_v40 = vld [vmem:[%s3574_s18 + $0x240] sm:$0xff]   ;;  %v440_v41 = vld [vmem:[%s3574_s18 + $0x248] sm:$0xff]  }
  0x28   : > { %425 = vst [vmem:[%s3582_s19 + $0x128] sm:$0xff] %v424_v37   ;;  %429 = vst [vmem:[%s3582_s19 + $0x130] sm:$0xff] %v428_v38   ;;  %v444_v42 = vld [vmem:[%s3574_s18 + $0x250] sm:$0xff]   ;;  %v448_v43 = vld [vmem:[%s3574_s18 + $0x258] sm:$0xff]  }
  0x29   : > { %433 = vst [vmem:[%s3582_s19 + $0x138] sm:$0xff] %v432_v39   ;;  %437 = vst [vmem:[%s3582_s19 + $0x140] sm:$0xff] %v436_v40   ;;  %v452_v44 = vld [vmem:[%s3574_s18 + $0x260] sm:$0xff]   ;;  %v456_v45 = vld [vmem:[%s3574_s18 + $0x268] sm:$0xff]  }
  0x2a   : > { %441 = vst [vmem:[%s3582_s19 + $0x148] sm:$0xff] %v440_v41   ;;  %445 = vst [vmem:[%s3582_s19 + $0x150] sm:$0xff] %v444_v42   ;;  %v460_v46 = vld [vmem:[%s3574_s18 + $0x270] sm:$0xff]   ;;  %v464_v47 = vld [vmem:[%s3574_s18 + $0x278] sm:$0xff]  }
  0x2b   : > { %449 = vst [vmem:[%s3582_s19 + $0x158] sm:$0xff] %v448_v43   ;;  %453 = vst [vmem:[%s3582_s19 + $0x160] sm:$0xff] %v452_v44  }
  0x2c   : > { %457 = vst [vmem:[%s3582_s19 + $0x168] sm:$0xff] %v456_v45   ;;  %461 = vst [vmem:[%s3582_s19 + $0x170] sm:$0xff] %v460_v46  }
  0x2d   : > { %465 = vst [vmem:[%s3582_s19 + $0x178] sm:$0xff] %v464_v47  }
  0x2e PF: > { %p2842_p10 = scmp.ge.s32.totalorder %s3474_s27, 1  ;;  %p682_p11 = scmp.lt.s32.totalorder %s3474_s27, 3 }
  0x30   : > { %p683_p12 = pnand %p2842_p10, %p682_p11 }
  0x31   : > { %p729_p13 = scmp.lt.s32.totalorder (!%p683_p12), %s3540_s28, 1  ;;  %s3691_s9 = sand.u32 (!%p683_p12), 1, %s3466_s25  }
  0x32   : > { %686 = sbr.rel (%p683_p12) target bundleno = 407 (0x197), region = 85  ;;  %s3476_s8 = smov (!%p683_p12), [#allocation3]  }
  0x33   : > { %s3297_s16 = smul.u32 (!%p683_p12), 384, %s3691_s9  ;;  %s3418_s15 = sshll.u32 (!%p683_p12), %s3476_s8, 4  ;;  %s3419_s15 = int_to_ptr.vmem [resolvable:$false] %s3418_s15 }
  0x37   : > { %vm977_vm0 = vcmask 1041408   ;;  %v3341_v48 = vld [vmem:[%s4484_s4 + $0x10] ss:$0 sps:$4 sm:$0x33]   ;;  %v741_v49 = vlaneseq  ;;  %v847_v50 = vld [vmem:[%s4483_s3] sm:$0x3] }
  0x38   : > { %3293 = vmatprep.subr.msk.bf16.mxu1 %vm977_vm0, %v3341_v48  ;;  %v1462_v51 = vsel %vm977_vm0, %v3341_v48, 0  ;;  %3292 = vmatprep.subr.msk.bf16.mxu0 %vm977_vm0, %v847_v50  ;;  %v979_v52 = vsel %vm977_vm0, %v847_v50, 0  ;;  %v3342_v53 = vld [vmem:[%s4484_s4 + $0x8] sm:$0xff]   ;;  %s730_s13 = scalar_select %p729_p13, %s3540_s28, 1  ;;  %vm928_vm1 = vcmask 31744   ;;  %v3345_v56 = vld [vmem:[%s4484_s4] sm:$0xff]  }
  0x39   : > { %v742_v54 = vshrl.u32 %v741_v49, 7  ;;  %3179 = vmatpush3.bf16.msra.mxu1 %v1462_v51  ;;  %3145 = vmatpush3.bf16.msra.mxu0 %v979_v52  ;;  %vm1412_vm2 = vcmask 293888   ;;  %v3348_v58 = vld [vmem:[%s4484_s4 + $0x24] ss:$0 sps:$4 sm:$0x33]   ;;  %v3719_v62 = vld [vmem:[%s4484_s4 + $0x1c] sm:$0xff]  }
  0x3a   : > { %3180 = vmatprep.subr.bf16.mxu1 %v3342_v53  ;;  %s2843_s19 = sshll.u32 %s730_s13, 1  ;;  %s3069_s20 = sshll.u32 %s730_s13, 7  ;;  %3294 = vmatprep.subr.msk.bf16.mxu0 %vm977_vm0, %v3348_v58  ;;  %v3349_v59 = vld [vmem:[%s4484_s4 + $0x38] ss:$0 sps:$4 sm:$0x33]   ;;  %v3714_v60 = vsel %vm977_vm0, %v3348_v58, 0 }
  0x3b   : > { %v743_v55 = vsub.s32 0, %v742_v54  ;;  %v747_v57 = vsub.s32 1, %v742_v54  ;;  %s732_s23 = scalar_lea.vmem %s4480_s0, %s2843_s19  ;;  %s3707_s14 = scalar_lea.vmem %s4481_s1, %s3069_s20  ;;  %v3733_v4 = vsel %vm977_vm0, %v3349_v59, 0  ;;  %v3361_v12 = vld [vmem:[%s4484_s4 + $0x30] sm:$0xff]   ;;  %v3375_v22 = vld [vmem:[%s4484_s4 + $0x28] sm:$0xff]  }
  0x3c   : > { %v739_v61 = vld [vmem:[%s732_s23] sm:$0x3]  ;;  %v3344_v2 = vld [vmem:[%s3707_s14 + $0x8] sm:$0xff]   ;;  %s3298_s19 = smul.u32 1536, %s3691_s9  ;;  %s3728_s20 = scalar_lea.vmem [#allocation2], %s3297_s16  ;;  %v3350_v6 = vld [vmem:[%s3707_s14 + $0x10] sm:$0xff]  }
  0x3d   : > { %3181 = vmatpush3.bf16.msra.mxu1 %v3342_v53  ;;  %v3721_v63 = vrot.slane %v739_v61, %v743_v55  ;;  %v3723_v0 = vrot.slane %v739_v61, %v747_v57  ;;  %v3343_v1 = vld [vmem:[%s3707_s14] sm:$0xff]   ;;  %v3737_v5 = vld [vmem:[%s3728_s20 + $0x8] sm:$0xff]   ;;  %v3352_v7 = vld [vmem:[%s3728_s20 + $0x10] sm:$0xff]   ;;  %s2732_s23 = scalar_lea.sflag [#allocation4], %s3691_s9 }
  0x3e   : > { %3182 = vmatprep.subr.bf16.mxu1 %v3345_v56  ;;  %3146 = vmatprep.mubr.msk.bf16.mxu0 %vm928_vm1, %v3343_v1  ;;  %v3346_v3 = vld [vmem:[%s3728_s20] sm:$0xff]   ;;  %s3741_s21 = scalar_lea.vmem [#allocation3], %s3298_s19  ;;  %v3351_v8 = vld [vmem:[%s3707_s14 + $0x18] sm:$0xff]   ;;  %v3355_v13 = vld [vmem:[%s3707_s14 + $0x28] sm:$0xff]   ;;  %s3299_s19 = smul.u32 24576, %s3540_s28 }
  0x3f   : > { %3147 = vmatmul.mubr.msk.bf16.vlgmr.msra.gmra.mxu0 %vm928_vm1, %v3344_v2  ;;  %3184 = vmatprep.mubr.msk.bf16.mxu1 %vm1412_vm2, %v3346_v3  ;;  %751 = vst [vmem:[%s3741_s21] sm:$0xff] %v3721_v63  ;;  %752 = vst [vmem:[%s3741_s21 + $0x8] sm:$0xff] %v3723_v0  ;;  %v3354_v9 = vld [vmem:[%s3707_s14 + $0x20] sm:$0xff]   ;;  %v3353_v10 = vld [vmem:[%s3728_s20 + $0x18] sm:$0xff]   ;;  %s2745_s16 = sshll.u32 %s3741_s21, 4  ;;  %s4429_s16 = int_to_ptr.vmem [resolvable:$true] %s2745_s16 }
  0x40   : > { %753 = vst [vmem:[%s3741_s21 + $0x30] sm:$0xff] %v3721_v63  ;;  %754 = vst [vmem:[%s3741_s21 + $0x38] sm:$0xff] %v3723_v0  ;;  %3217 = vmatpush3.bf16.msra.mxu0 %v3714_v60  ;;  %3150 = vmatprep.mubr.msk.bf16.mxu0 %vm928_vm1, %v3350_v6  ;;  %v3356_v11 = vld [vmem:[%s3728_s20 + $0x20] sm:$0xff]   ;;  %v3358_v14 = vld [vmem:[%s3707_s14 + $0x30] sm:$0xff]   ;;  %s4435_s22 = scalar_lea.hbm %s4487_s7, %s3299_s19  ;;  %s3414_s29 = scalar_lea.vmem %s4429_s16, 24576 }
  0x41   : > { %3183 = vmatpush3.bf16.msra.mxu1 %v3345_v56  ;;  %755 = vst [vmem:[%s3741_s21 + $0x60] sm:$0xff] %v3721_v63  ;;  %756 = vst [vmem:[%s3741_s21 + $0x68] sm:$0xff] %v3723_v0  ;;  %3218 = vmatprep.subr.bf16.mxu0 %v3719_v62  ;;  %v3357_v15 = vld [vmem:[%s3728_s20 + $0x28] sm:$0xff]   ;;  %v3362_v16 = vld [vmem:[%s3728_s20 + $0x30] sm:$0xff]   ;;  %p3415_p0 = scmp.ne.s32.totalorder %s4429_s16, %s3414_s29  ;;  %p3421_p3 = scmp.lt.s32.totalorder %s4429_s16, %s3419_s15 }
  0x42   : > { %3295 = vmatprep.subr.msk.bf16.mxu1 %vm977_vm0, %v3349_v59  ;;  %757 = vst [vmem:[%s3741_s21 + $0x90] sm:$0xff] %v3721_v63  ;;  %758 = vst [vmem:[%s3741_s21 + $0x98] sm:$0xff] %v3723_v0  ;;  %v3359_v17 = vld [vmem:[%s3707_s14 + $0x38] sm:$0xff]   ;;  %v3364_v18 = vld [vmem:[%s3707_s14 + $0x40] sm:$0xff]  }
  0x43   : > { %759 = vst [vmem:[%s3741_s21 + $0xc0] sm:$0xff] %v3721_v63  ;;  %760 = vst [vmem:[%s3741_s21 + $0xc8] sm:$0xff] %v3723_v0  ;;  %v3363_v19 = vld [vmem:[%s3728_s20 + $0x38] sm:$0xff]   ;;  %v3366_v20 = vld [vmem:[%s3728_s20 + $0x40] sm:$0xff]   ;;  %p3416_p1 = pnand %p3415_p0, %p3558_p6 }
  0x44   : > { %761 = vst [vmem:[%s3741_s21 + $0xf0] sm:$0xff] %v3721_v63  ;;  %762 = vst [vmem:[%s3741_s21 + $0xf8] sm:$0xff] %v3723_v0  ;;  %3185 = vmatmul.mubr.msk.bf16.vlgmr.msra.gmra.mxu1 %vm1412_vm2, %v3737_v5  ;;  %3219 = vmatpush3.bf16.msra.mxu0 %v3719_v62  ;;  %v3374_v21 = vld [vmem:[%s4484_s4 + $0x14] sm:$0xff]   ;;  %v3365_v23 = vld [vmem:[%s3707_s14 + $0x48] sm:$0xff]  }
  0x45   : > { %763 = vst [vmem:[%s3741_s21 + $0x120] sm:$0xff] %v3721_v63  ;;  %764 = vst [vmem:[%s3741_s21 + $0x128] sm:$0xff] %v3723_v0  ;;  %3255 = vmatpush3.bf16.msra.mxu1 %v3733_v4  ;;  %3188 = vmatprep.mubr.msk.bf16.mxu1 %vm1412_vm2, %v3352_v7  ;;  %v3368_v24 = vld [vmem:[%s3707_s14 + $0x50] sm:$0xff]   ;;  %v3367_v25 = vld [vmem:[%s3728_s20 + $0x48] sm:$0xff]   ;;  %p3417_p2 = pneg %p3416_p1 }
  0x46   : > { %765 = vst [vmem:[%s3741_s21 + $0x150] sm:$0xff] %v3721_v63  ;;  %766 = vst [vmem:[%s3741_s21 + $0x158] sm:$0xff] %v3723_v0  ;;  %3256 = vmatprep.subr.bf16.mxu1 %v3361_v12  ;;  %3220 = vmatprep.subr.bf16.mxu0 %v3374_v21  ;;  %v3370_v26 = vld [vmem:[%s3728_s20 + $0x50] sm:$0xff]   ;;  %v3369_v27 = vld [vmem:[%s3707_s14 + $0x58] sm:$0xff]  }
  0x47   : > { %767 = vst [vmem:[%s3741_s21 + $0x180] sm:$0xff] %v3721_v63  ;;  %768 = vst [vmem:[%s3741_s21 + $0x188] sm:$0xff] %v3723_v0  ;;  %3151 = vmatmul.mubr.msk.bf16.gmra.mxu0 %vm928_vm1, %v3351_v8  ;;  %v3372_v28 = vld [vmem:[%s3707_s14 + $0x60] sm:$0xff]   ;;  %v3371_v29 = vld [vmem:[%s3728_s20 + $0x58] sm:$0xff]  }
  0x48   : > { %769 = vst [vmem:[%s3741_s21 + $0x1b0] sm:$0xff] %v3721_v63  ;;  %770 = vst [vmem:[%s3741_s21 + $0x1b8] sm:$0xff] %v3723_v0  ;;  %3154 = vmatprep.mubr.msk.bf16.mxu0 %vm928_vm1, %v3354_v9  ;;  %3221 = vmatpush3.bf16.msra.mxu0 %v3374_v21  ;;  %v3376_v30 = vld [vmem:[%s3728_s20 + $0x60] sm:$0xff]   ;;  %v3373_v31 = vld [vmem:[%s3707_s14 + $0x68] sm:$0xff]  }
  0x49   : > { %771 = vst [vmem:[%s3741_s21 + $0x1e0] sm:$0xff] %v3721_v63  ;;  %772 = vst [vmem:[%s3741_s21 + $0x1e8] sm:$0xff] %v3723_v0  ;;  %3257 = vmatpush3.bf16.msra.mxu1 %v3361_v12  ;;  %v3378_v32 = vld [vmem:[%s3707_s14 + $0x70] sm:$0xff]   ;;  %v3377_v33 = vld [vmem:[%s3728_s20 + $0x68] sm:$0xff]  }
  0x4a   : > { %773 = vst [vmem:[%s3741_s21 + $0x210] sm:$0xff] %v3721_v63  ;;  %774 = vst [vmem:[%s3741_s21 + $0x218] sm:$0xff] %v3723_v0  ;;  %3258 = vmatprep.subr.bf16.mxu1 %v3375_v22  ;;  %v3380_v34 = vld [vmem:[%s3728_s20 + $0x70] sm:$0xff]   ;;  %v3379_v35 = vld [vmem:[%s3707_s14 + $0x78] sm:$0xff]   ;;  %s3420_s14 = scalar_lea.vmem %s3419_s15, 49152 }
  0x4b   : > { %775 = vst [vmem:[%s3741_s21 + $0x240] sm:$0xff] %v3721_v63  ;;  %776 = vst [vmem:[%s3741_s21 + $0x248] sm:$0xff] %v3723_v0  ;;  %v3382_v36 = vld [vmem:[%s3728_s20 + $0x80] sm:$0xff]   ;;  %v3381_v37 = vld [vmem:[%s3728_s20 + $0x78] sm:$0xff]   ;;  %p3422_p4 = scmp.lt.s32.totalorder %s3420_s14, %s3414_s29 }
  0x4c   : > { %777 = vst [vmem:[%s3741_s21 + $0x270] sm:$0xff] %v3721_v63  ;;  %778 = vst [vmem:[%s3741_s21 + $0x278] sm:$0xff] %v3723_v0  ;;  %3189 = vmatmul.mubr.msk.bf16.gmra.mxu1 %vm1412_vm2, %v3353_v10  ;;  %v3384_v38 = vld [vmem:[%s3728_s20 + $0x100] sm:$0xff]   ;;  %v3383_v39 = vld [vmem:[%s3728_s20 + $0x88] sm:$0xff]  }
  0x4d   : > { %779 = vst [vmem:[%s3741_s21 + $0x2a0] sm:$0xff] %v3721_v63  ;;  %780 = vst [vmem:[%s3741_s21 + $0x2a8] sm:$0xff] %v3723_v0  ;;  %3192 = vmatprep.mubr.msk.bf16.mxu1 %vm1412_vm2, %v3356_v11  ;;  %3259 = vmatpush3.bf16.msra.mxu1 %v3375_v22  ;;  %v3386_v40 = vld [vmem:[%s3728_s20 + $0x90] sm:$0xff]   ;;  %v3385_v41 = vld [vmem:[%s3728_s20 + $0x108] sm:$0xff]   ;;  %p3423_p5 = por %p3422_p4, %p3421_p3 }
  0x4e   : > { %781 = vst [vmem:[%s3741_s21 + $0x2d0] sm:$0xff] %v3721_v63  ;;  %782 = vst [vmem:[%s3741_s21 + $0x2d8] sm:$0xff] %v3723_v0  ;;  %v3388_v42 = vld [vmem:[%s3728_s20 + $0x110] sm:$0xff]   ;;  %v3387_v43 = vld [vmem:[%s3728_s20 + $0x98] sm:$0xff]  }
  0x4f   : > { %783 = vst [vmem:[%s3741_s21 + $0x300] sm:$0xff] %v3721_v63  ;;  %784 = vst [vmem:[%s3741_s21 + $0x308] sm:$0xff] %v3723_v0  ;;  %3155 = vmatmul.mubr.msk.bf16.gmra.mxu0 %vm928_vm1, %v3355_v13  ;;  %v3390_v44 = vld [vmem:[%s3728_s20 + $0xa0] sm:$0xff]   ;;  %v3389_v45 = vld [vmem:[%s3728_s20 + $0x118] sm:$0xff]   ;;  %p3424_p7 = pnand %p3423_p5, %p3417_p2 }
  0x50   : > { %785 = vst [vmem:[%s3741_s21 + $0x330] sm:$0xff] %v3721_v63  ;;  %786 = vst [vmem:[%s3741_s21 + $0x338] sm:$0xff] %v3723_v0  ;;  %3158 = vmatprep.mubr.msk.bf16.mxu0 %vm928_vm1, %v3358_v14  ;;  %v3392_v46 = vld [vmem:[%s3728_s20 + $0x120] sm:$0xff]   ;;  %v3391_v47 = vld [vmem:[%s3728_s20 + $0xa8] sm:$0xff]  }
  0x51   : > { %787 = vst [vmem:[%s3741_s21 + $0x360] sm:$0xff] %v3721_v63  ;;  %788 = vst [vmem:[%s3741_s21 + $0x368] sm:$0xff] %v3723_v0  ;;  %v3394_v48 = vld [vmem:[%s3728_s20 + $0xb0] sm:$0xff]   ;;  %v3393_v49 = vld [vmem:[%s3728_s20 + $0x128] sm:$0xff]  }
  0x52   : > { %789 = vst [vmem:[%s3741_s21 + $0x390] sm:$0xff] %v3721_v63  ;;  %790 = vst [vmem:[%s3741_s21 + $0x398] sm:$0xff] %v3723_v0  ;;  %v3396_v50 = vld [vmem:[%s3728_s20 + $0x130] sm:$0xff]   ;;  %v3395_v51 = vld [vmem:[%s3728_s20 + $0xb8] sm:$0xff]  }
  0x53   : > { %791 = vst [vmem:[%s3741_s21 + $0x3c0] sm:$0xff] %v3721_v63  ;;  %792 = vst [vmem:[%s3741_s21 + $0x3c8] sm:$0xff] %v3723_v0  ;;  %v3398_v52 = vld [vmem:[%s3728_s20 + $0xc0] sm:$0xff]   ;;  %v3397_v53 = vld [vmem:[%s3728_s20 + $0x138] sm:$0xff]  }
  0x54   : > { %793 = vst [vmem:[%s3741_s21 + $0x3f0] sm:$0xff] %v3721_v63  ;;  %794 = vst [vmem:[%s3741_s21 + $0x3f8] sm:$0xff] %v3723_v0  ;;  %3193 = vmatmul.mubr.msk.bf16.gmra.mxu1 %vm1412_vm2, %v3357_v15  ;;  %v3400_v54 = vld [vmem:[%s3728_s20 + $0x140] sm:$0xff]   ;;  %v3399_v55 = vld [vmem:[%s3728_s20 + $0xc8] sm:$0xff]  }
  0x55   : > { %795 = vst [vmem:[%s3741_s21 + $0x420] sm:$0xff] %v3721_v63  ;;  %796 = vst [vmem:[%s3741_s21 + $0x428] sm:$0xff] %v3723_v0  ;;  %3196 = vmatprep.mubr.msk.bf16.mxu1 %vm1412_vm2, %v3362_v16  ;;  %v3402_v56 = vld [vmem:[%s3728_s20 + $0xd0] sm:$0xff]   ;;  %v3401_v57 = vld [vmem:[%s3728_s20 + $0x148] sm:$0xff]  }
  0x56   : > { %797 = vst [vmem:[%s3741_s21 + $0x450] sm:$0xff] %v3721_v63  ;;  %798 = vst [vmem:[%s3741_s21 + $0x458] sm:$0xff] %v3723_v0  ;;  %v3404_v58 = vld [vmem:[%s3728_s20 + $0x150] sm:$0xff]   ;;  %v3403_v59 = vld [vmem:[%s3728_s20 + $0xd8] sm:$0xff]  }
  0x57   : > { %799 = vst [vmem:[%s3741_s21 + $0x480] sm:$0xff] %v3721_v63  ;;  %800 = vst [vmem:[%s3741_s21 + $0x488] sm:$0xff] %v3723_v0  ;;  %3159 = vmatmul.mubr.msk.bf16.gmra.mxu0 %vm928_vm1, %v3359_v17  ;;  %v3406_v60 = vld [vmem:[%s3728_s20 + $0xe0] sm:$0xff]   ;;  %v3405_v61 = vld [vmem:[%s3728_s20 + $0x158] sm:$0xff]  }
  0x58   : > { %801 = vst [vmem:[%s3741_s21 + $0x4b0] sm:$0xff] %v3721_v63  ;;  %802 = vst [vmem:[%s3741_s21 + $0x4b8] sm:$0xff] %v3723_v0  ;;  %3162 = vmatprep.mubr.msk.bf16.mxu0 %vm928_vm1, %v3364_v18  ;;  %v3408_v62 = vld [vmem:[%s3728_s20 + $0x160] sm:$0xff]   ;;  %v3409_v1 = vld [vmem:[%s3728_s20 + $0x168] sm:$0xff]  }
  0x59   : > { %803 = vst [vmem:[%s3741_s21 + $0x4e0] sm:$0xff] %v3721_v63  ;;  %804 = vst [vmem:[%s3741_s21 + $0x4e8] sm:$0xff] %v3723_v0  ;;  %v3412_v2 = vld [vmem:[%s3728_s20 + $0x170] sm:$0xff]   ;;  %v3411_v3 = vld [vmem:[%s3728_s20 + $0xf8] sm:$0xff]  }
  0x5a   : > { %805 = vst [vmem:[%s3741_s21 + $0x510] sm:$0xff] %v3721_v63  ;;  %806 = vst [vmem:[%s3741_s21 + $0x518] sm:$0xff] %v3723_v0  ;;  %v3413_v4 = vld [vmem:[%s3728_s20 + $0x178] sm:$0xff]   ;;  %v4009_v5 = vld [vmem:[%s4485_s5] ss:$0 sm:$0xff] }
  0x5b   : > { %807 = vst [vmem:[%s3741_s21 + $0x540] sm:$0xff] %v3721_v63  ;;  %808 = vst [vmem:[%s3741_s21 + $0x548] sm:$0xff] %v3723_v0  ;;  %v4014_v7 = vld [vmem:[%s4486_s6] ss:$0 sm:$0xff]  ;;  %v4019_v8 = vld [vmem:[%s4485_s5 + $0x1] ss:$0 sm:$0xff] }
  0x5c   : > { %809 = vst [vmem:[%s3741_s21 + $0x570] sm:$0xff] %v3721_v63  ;;  %810 = vst [vmem:[%s3741_s21 + $0x578] sm:$0xff] %v3723_v0  ;;  %3197 = vmatmul.mubr.msk.bf16.gmra.mxu1 %vm1412_vm2, %v3363_v19  ;;  %v4025_v12 = vld [vmem:[%s4486_s6 + $0x1] ss:$0 sm:$0xff] }
  0x5d   : > { %811 = vst [vmem:[%s3741_s21 + $0x5a0] sm:$0xff] %v3721_v63  ;;  %812 = vst [vmem:[%s3741_s21 + $0x5a8] sm:$0xff] %v3723_v0  ;;  %3200 = vmatprep.mubr.msk.bf16.mxu1 %vm1412_vm2, %v3366_v20 }
  0x5e   : > { %813 = vst [vmem:[%s3741_s21 + $0x5d0] sm:$0xff] %v3721_v63  ;;  %814 = vst [vmem:[%s3741_s21 + $0x5d8] sm:$0xff] %v3723_v0  ;;  %v3407_v63 = vld [vmem:[%s3728_s20 + $0xe8] sm:$0xff]   ;;  %v3410_v0 = vld [vmem:[%s3728_s20 + $0xf0] sm:$0xff]  }
  0x5f   : > { %3163 = vmatmul.mubr.msk.bf16.gmra.mxu0 %vm928_vm1, %v3365_v23 }
  0x60   : > { %3166 = vmatprep.mubr.msk.bf16.mxu0 %vm928_vm1, %v3368_v24 }
  0x64   : > { %3201 = vmatmul.mubr.msk.bf16.gmra.mxu1 %vm1412_vm2, %v3367_v25 }
  0x65   : > { %3204 = vmatprep.mubr.msk.bf16.mxu1 %vm1412_vm2, %v3370_v26 }
  0x67   : > { %3167 = vmatmul.mubr.msk.bf16.gmra.mxu0 %vm928_vm1, %v3369_v27 }
  0x68   : > { %3170 = vmatprep.mubr.msk.bf16.mxu0 %vm928_vm1, %v3372_v28 }
  0x6c   : > { %3205 = vmatmul.mubr.msk.bf16.gmra.mxu1 %vm1412_vm2, %v3371_v29 }
  0x6d   : > { %3208 = vmatprep.mubr.msk.bf16.mxu1 %vm1412_vm2, %v3376_v30 }
  0x6f   : > { %3171 = vmatmul.mubr.msk.bf16.gmra.mxu0 %vm928_vm1, %v3373_v31 }
  0x70   : > { %3174 = vmatprep.mubr.msk.bf16.mxu0 %vm928_vm1, %v3378_v32 }
  0x74   : > { %3209 = vmatmul.mubr.msk.bf16.gmra.mxu1 %vm1412_vm2, %v3377_v33 }
  0x75   : > { %3212 = vmatprep.mubr.msk.bf16.mxu1 %vm1412_vm2, %v3380_v34 }
  0x77   : > { %3175 = vmatmul.mubr.msk.bf16.gmra.mxu0 %vm928_vm1, %v3379_v35 }
  0x78   : > { %3222 = vmatprep.mubr.msk.bf16.mxu0 %vm1412_vm2, %v3382_v36 }
  0x7c   : > { %3213 = vmatmul.mubr.msk.bf16.gmra.mxu1 %vm1412_vm2, %v3381_v37 }
  0x7d   : > { %3260 = vmatprep.mubr.msk.bf16.mxu1 %vm1412_vm2, %v3384_v38 }
  0x7f   : > { %3223 = vmatmul.mubr.msk.bf16.vlgmr.msra.gmra.mxu0 %vm1412_vm2, %v3383_v39 }
  0x80   : > { %3226 = vmatprep.mubr.msk.bf16.mxu0 %vm1412_vm2, %v3386_v40 }
  0x84   : > { %3261 = vmatmul.mubr.msk.bf16.vlgmr.msra.gmra.mxu1 %vm1412_vm2, %v3385_v41 }
  0x85   : > { %3264 = vmatprep.mubr.msk.bf16.mxu1 %vm1412_vm2, %v3388_v42 }
  0x87   : > { %3227 = vmatmul.mubr.msk.bf16.gmra.mxu0 %vm1412_vm2, %v3387_v43 }
  0x88   : > { %3230 = vmatprep.mubr.msk.bf16.mxu0 %vm1412_vm2, %v3390_v44 }
  0x8c   : > { %3265 = vmatmul.mubr.msk.bf16.gmra.mxu1 %vm1412_vm2, %v3389_v45 }
  0x8d   : > { %3268 = vmatprep.mubr.msk.bf16.mxu1 %vm1412_vm2, %v3392_v46 }
  0x8f   : > { %3231 = vmatmul.mubr.msk.bf16.gmra.mxu0 %vm1412_vm2, %v3391_v47 }
  0x90   : > { %3234 = vmatprep.mubr.msk.bf16.mxu0 %vm1412_vm2, %v3394_v48 }
  0x94   : > { %3269 = vmatmul.mubr.msk.bf16.gmra.mxu1 %vm1412_vm2, %v3393_v49 }
  0x95   : > { %3272 = vmatprep.mubr.msk.bf16.mxu1 %vm1412_vm2, %v3396_v50 }
  0x97   : > { %3235 = vmatmul.mubr.msk.bf16.gmra.mxu0 %vm1412_vm2, %v3395_v51 }
  0x98   : > { %3238 = vmatprep.mubr.msk.bf16.mxu0 %vm1412_vm2, %v3398_v52 }
  0x9c   : > { %3273 = vmatmul.mubr.msk.bf16.gmra.mxu1 %vm1412_vm2, %v3397_v53 }
  0x9d   : > { %3276 = vmatprep.mubr.msk.bf16.mxu1 %vm1412_vm2, %v3400_v54 }
  0x9f   : > { %3239 = vmatmul.mubr.msk.bf16.gmra.mxu0 %vm1412_vm2, %v3399_v55 }
  0xa0   : > { %3242 = vmatprep.mubr.msk.bf16.mxu0 %vm1412_vm2, %v3402_v56 }
  0xa4   : > { %3277 = vmatmul.mubr.msk.bf16.gmra.mxu1 %vm1412_vm2, %v3401_v57 }
  0xa5   : > { %3280 = vmatprep.mubr.msk.bf16.mxu1 %vm1412_vm2, %v3404_v58 }
  0xa7   : > { %3243 = vmatmul.mubr.msk.bf16.gmra.mxu0 %vm1412_vm2, %v3403_v59 }
  0xa8   : > { %3246 = vmatprep.mubr.msk.bf16.mxu0 %vm1412_vm2, %v3406_v60 }
  0xac   : > { %3281 = vmatmul.mubr.msk.bf16.gmra.mxu1 %vm1412_vm2, %v3405_v61 }
  0xad   : > { %3284 = vmatprep.mubr.msk.bf16.mxu1 %vm1412_vm2, %v3408_v62 }
  0xaf   : > { %3247 = vmatmul.mubr.msk.bf16.gmra.mxu0 %vm1412_vm2, %v3407_v63 }
  0xb0   : > { %3250 = vmatprep.mubr.msk.bf16.mxu0 %vm1412_vm2, %v3410_v0 }
  0xb4   : > { %3285 = vmatmul.mubr.msk.bf16.gmra.mxu1 %vm1412_vm2, %v3409_v1 }
  0xb5   : > { %3288 = vmatprep.mubr.msk.bf16.mxu1 %vm1412_vm2, %v3412_v2 }
  0xb7   : > { %3251 = vmatmul.mubr.msk.bf16.gmra.mxu0 %vm1412_vm2, %v3411_v3 }
  0xbc   : > { %3289 = vmatmul.mubr.msk.bf16.gmra.mxu1 %vm1412_vm2, %v3413_v4 }
  0xff   : > { %v3148_v6 = vpop.f32.mrf.mxu0 }
 0x100   : > { %v1149_v9 = vmul.f32 %v3148_v6, %v4009_v5 }
 0x101   : > { %v1015_v10 = vpop.f32.mrf.mxu0 }
 0x102   : > { %v1186_v13 = vadd.f32 %v4014_v7, %v1149_v9  ;;  %v1147_v14 = vmul.f32 %v4009_v5, %v1015_v10 }
 0x103   : > { %v3149_v16 = vpop.f32.mrf.mxu0 }
 0x104   : > { %v3186_v11 = vpop.f32.mrf.mxu1  ;;  %v1218_v18 = vmax.f32 %v1186_v13, 0.0  ;;  %v1184_v19 = vadd.f32 %v4014_v7, %v1147_v14  ;;  %v1150_v20 = vmul.f32 %v3149_v16, %v4009_v5 }
 0x105   : > { %v1632_v15 = vmul.f32 %v3186_v11, %v4019_v8  ;;  %v1018_v22 = vpop.f32.mrf.mxu0 }
 0x106   : > { %v1498_v17 = vpop.f32.mrf.mxu1  ;;  %1250 = vst [vmem:[%s3741_s21 + $0x70] sm:$0xff] %v1218_v18  ;;  %v1216_v25 = vmax.f32 %v1184_v19, 0.0  ;;  %v1187_v26 = vadd.f32 %v4014_v7, %v1150_v20  ;;  %v1148_v28 = vmul.f32 %v4009_v5, %v1018_v22 }
 0x107   : > { %v1669_v21 = vadd.f32 %v4025_v12, %v1632_v15  ;;  %v1630_v23 = vmul.f32 %v4019_v8, %v1498_v17  ;;  %v3152_v30 = vpop.f32.mrf.mxu0 }
 0x108   : > { %v3187_v24 = vpop.f32.mrf.mxu1  ;;  %1248 = vst [vmem:[%s3741_s21 + $0x10] sm:$0xff] %v1216_v25  ;;  %v1219_v33 = vmax.f32 %v1187_v26, 0.0  ;;  %v1185_v34 = vadd.f32 %v4014_v7, %v1148_v28  ;;  %v1153_v35 = vmul.f32 %v3152_v30, %v4009_v5 }
 0x109   : > { %v1701_v27 = vmax.f32 %v1669_v21, 0.0  ;;  %v1667_v29 = vadd.f32 %v4025_v12, %v1630_v23  ;;  %v1633_v31 = vmul.f32 %v3187_v24, %v4019_v8  ;;  %v1031_v39 = vpop.f32.mrf.mxu0 }
 0x10a   : > { %v1501_v32 = vpop.f32.mrf.mxu1  ;;  %1251 = vst [vmem:[%s3741_s21 + $0xa0] sm:$0xff] %v1219_v33  ;;  %v1217_v41 = vmax.f32 %v1185_v34, 0.0  ;;  %v1190_v42 = vadd.f32 %v4014_v7, %v1153_v35  ;;  %v1151_v43 = vmul.f32 %v4009_v5, %v1031_v39 }
 0x10b   : > { %1733 = vst [vmem:[%s3741_s21 + $0x78] sm:$0xff] %v1701_v27  ;;  %v1631_v36 = vmul.f32 %v4019_v8, %v1501_v32  ;;  %v1699_v37 = vmax.f32 %v1667_v29, 0.0  ;;  %v1670_v38 = vadd.f32 %v4025_v12, %v1633_v31  ;;  %v3153_v46 = vpop.f32.mrf.mxu0 }
 0x10c   : > { %v3190_v40 = vpop.f32.mrf.mxu1  ;;  %1249 = vst [vmem:[%s3741_s21 + $0x40] sm:$0xff] %v1217_v41  ;;  %v1222_v49 = vmax.f32 %v1190_v42, 0.0  ;;  %v1188_v50 = vadd.f32 %v4014_v7, %v1151_v43  ;;  %v1154_v52 = vmul.f32 %v3153_v46, %v4009_v5 }
 0x10d   : > { %v1668_v44 = vadd.f32 %v4025_v12, %v1631_v36  ;;  %1731 = vst [vmem:[%s3741_s21 + $0x18] sm:$0xff] %v1699_v37  ;;  %v1702_v45 = vmax.f32 %v1670_v38, 0.0  ;;  %v1636_v47 = vmul.f32 %v3190_v40, %v4019_v8  ;;  %v1034_v54 = vpop.f32.mrf.mxu0 }
 0x10e   : > { %v1514_v48 = vpop.f32.mrf.mxu1  ;;  %1254 = vst [vmem:[%s3741_s21 + $0x130] sm:$0xff] %v1222_v49  ;;  %v1220_v57 = vmax.f32 %v1188_v50, 0.0  ;;  %v1191_v58 = vadd.f32 %v4014_v7, %v1154_v52  ;;  %v1152_v59 = vmul.f32 %v4009_v5, %v1034_v54 }
 0x10f   : > { %v1700_v51 = vmax.f32 %v1668_v44, 0.0  ;;  %1734 = vst [vmem:[%s3741_s21 + $0xa8] sm:$0xff] %v1702_v45  ;;  %v1673_v53 = vadd.f32 %v4025_v12, %v1636_v47  ;;  %v1634_v55 = vmul.f32 %v4019_v8, %v1514_v48  ;;  %v3156_v63 = vpop.f32.mrf.mxu0 }
 0x110   : > { %v3191_v56 = vpop.f32.mrf.mxu1  ;;  %1252 = vst [vmem:[%s3741_s21 + $0xd0] sm:$0xff] %v1220_v57  ;;  %v1223_v1 = vmax.f32 %v1191_v58, 0.0  ;;  %v1189_v2 = vadd.f32 %v4014_v7, %v1152_v59  ;;  %v1157_v3 = vmul.f32 %v3156_v63, %v4009_v5 }
 0x111   : > { %1732 = vst [vmem:[%s3741_s21 + $0x48] sm:$0xff] %v1700_v51  ;;  %v1637_v60 = vmul.f32 %v3191_v56, %v4019_v8  ;;  %v1705_v61 = vmax.f32 %v1673_v53, 0.0  ;;  %v1671_v62 = vadd.f32 %v4025_v12, %v1634_v55  ;;  %v1047_v9 = vpop.f32.mrf.mxu0 }
 0x112   : > { %v1517_v0 = vpop.f32.mrf.mxu1  ;;  %1255 = vst [vmem:[%s3741_s21 + $0x160] sm:$0xff] %v1223_v1  ;;  %v1221_v13 = vmax.f32 %v1189_v2, 0.0  ;;  %v1194_v14 = vadd.f32 %v4014_v7, %v1157_v3  ;;  %v1155_v16 = vmul.f32 %v4009_v5, %v1047_v9 }
 0x113   : > { %v1674_v4 = vadd.f32 %v4025_v12, %v1637_v60  ;;  %1737 = vst [vmem:[%s3741_s21 + $0x138] sm:$0xff] %v1705_v61  ;;  %v1703_v6 = vmax.f32 %v1671_v62, 0.0  ;;  %v1635_v10 = vmul.f32 %v4019_v8, %v1517_v0  ;;  %v3157_v18 = vpop.f32.mrf.mxu0 }
 0x114   : > { %v3194_v11 = vpop.f32.mrf.mxu1  ;;  %1253 = vst [vmem:[%s3741_s21 + $0x100] sm:$0xff] %v1221_v13  ;;  %v1226_v21 = vmax.f32 %v1194_v14, 0.0  ;;  %v1192_v22 = vadd.f32 %v4014_v7, %v1155_v16  ;;  %v1158_v23 = vmul.f32 %v3157_v18, %v4009_v5 }
 0x115   : > { %v1706_v15 = vmax.f32 %v1674_v4, 0.0  ;;  %1735 = vst [vmem:[%s3741_s21 + $0xd8] sm:$0xff] %v1703_v6  ;;  %v1672_v17 = vadd.f32 %v4025_v12, %v1635_v10  ;;  %v1640_v19 = vmul.f32 %v3194_v11, %v4019_v8  ;;  %v1050_v27 = vpop.f32.mrf.mxu0 }
 0x116   : > { %v1530_v20 = vpop.f32.mrf.mxu1  ;;  %1258 = vst [vmem:[%s3741_s21 + $0x1f0] sm:$0xff] %v1226_v21  ;;  %v1224_v29 = vmax.f32 %v1192_v22, 0.0  ;;  %v1195_v30 = vadd.f32 %v4014_v7, %v1158_v23  ;;  %v1156_v31 = vmul.f32 %v4009_v5, %v1050_v27 }
 0x117   : > { %1738 = vst [vmem:[%s3741_s21 + $0x168] sm:$0xff] %v1706_v15  ;;  %v1638_v24 = vmul.f32 %v4019_v8, %v1530_v20  ;;  %v1704_v25 = vmax.f32 %v1672_v17, 0.0  ;;  %v1677_v26 = vadd.f32 %v4025_v12, %v1640_v19  ;;  %v3160_v34 = vpop.f32.mrf.mxu0 }
 0x118   : > { %v3195_v28 = vpop.f32.mrf.mxu1  ;;  %1256 = vst [vmem:[%s3741_s21 + $0x190] sm:$0xff] %v1224_v29  ;;  %v1227_v37 = vmax.f32 %v1195_v30, 0.0  ;;  %v1193_v38 = vadd.f32 %v4014_v7, %v1156_v31  ;;  %v1161_v40 = vmul.f32 %v3160_v34, %v4009_v5 }
 0x119   : > { %v1675_v32 = vadd.f32 %v4025_v12, %v1638_v24  ;;  %1736 = vst [vmem:[%s3741_s21 + $0x108] sm:$0xff] %v1704_v25  ;;  %v1709_v33 = vmax.f32 %v1677_v26, 0.0  ;;  %v1641_v35 = vmul.f32 %v3195_v28, %v4019_v8  ;;  %v1063_v42 = vpop.f32.mrf.mxu0 }
 0x11a   : > { %v1533_v36 = vpop.f32.mrf.mxu1  ;;  %1259 = vst [vmem:[%s3741_s21 + $0x220] sm:$0xff] %v1227_v37  ;;  %v1225_v45 = vmax.f32 %v1193_v38, 0.0  ;;  %v1198_v46 = vadd.f32 %v4014_v7, %v1161_v40  ;;  %v1159_v47 = vmul.f32 %v4009_v5, %v1063_v42 }
 0x11b   : > { %v1707_v39 = vmax.f32 %v1675_v32, 0.0  ;;  %1741 = vst [vmem:[%s3741_s21 + $0x1f8] sm:$0xff] %v1709_v33  ;;  %v1678_v41 = vadd.f32 %v4025_v12, %v1641_v35  ;;  %v1639_v43 = vmul.f32 %v4019_v8, %v1533_v36  ;;  %v3161_v51 = vpop.f32.mrf.mxu0 }
 0x11c   : > { %v3198_v44 = vpop.f32.mrf.mxu1  ;;  %1257 = vst [vmem:[%s3741_s21 + $0x1c0] sm:$0xff] %v1225_v45  ;;  %v1230_v53 = vmax.f32 %v1198_v46, 0.0  ;;  %v1196_v54 = vadd.f32 %v4014_v7, %v1159_v47  ;;  %v1162_v55 = vmul.f32 %v3161_v51, %v4009_v5 }
 0x11d   : > { %1739 = vst [vmem:[%s3741_s21 + $0x198] sm:$0xff] %v1707_v39  ;;  %v1644_v48 = vmul.f32 %v3198_v44, %v4019_v8  ;;  %v1710_v49 = vmax.f32 %v1678_v41, 0.0  ;;  %v1676_v50 = vadd.f32 %v4025_v12, %v1639_v43  ;;  %v1066_v58 = vpop.f32.mrf.mxu0 }
 0x11e   : > { %v1546_v52 = vpop.f32.mrf.mxu1  ;;  %1262 = vst [vmem:[%s3741_s21 + $0x2b0] sm:$0xff] %v1230_v53  ;;  %v1228_v61 = vmax.f32 %v1196_v54, 0.0  ;;  %v1199_v62 = vadd.f32 %v4014_v7, %v1162_v55  ;;  %v1160_v0 = vmul.f32 %v4009_v5, %v1066_v58 }
 0x11f   : > { %v1681_v56 = vadd.f32 %v4025_v12, %v1644_v48  ;;  %1742 = vst [vmem:[%s3741_s21 + $0x228] sm:$0xff] %v1710_v49  ;;  %v1708_v57 = vmax.f32 %v1676_v50, 0.0  ;;  %v1642_v59 = vmul.f32 %v4019_v8, %v1546_v52  ;;  %v3164_v2 = vpop.f32.mrf.mxu0 }
 0x120   : > { %v3199_v60 = vpop.f32.mrf.mxu1  ;;  %1260 = vst [vmem:[%s3741_s21 + $0x250] sm:$0xff] %v1228_v61  ;;  %v1231_v6 = vmax.f32 %v1199_v62, 0.0  ;;  %v1197_v9 = vadd.f32 %v4014_v7, %v1160_v0  ;;  %v1165_v10 = vmul.f32 %v3164_v2, %v4009_v5 }
 0x121   : > { %v1713_v63 = vmax.f32 %v1681_v56, 0.0  ;;  %1740 = vst [vmem:[%s3741_s21 + $0x1c8] sm:$0xff] %v1708_v57  ;;  %v1679_v1 = vadd.f32 %v4025_v12, %v1642_v59  ;;  %v1645_v3 = vmul.f32 %v3199_v60, %v4019_v8  ;;  %v1079_v15 = vpop.f32.mrf.mxu0 }
 0x122   : > { %v1549_v4 = vpop.f32.mrf.mxu1  ;;  %1263 = vst [vmem:[%s3741_s21 + $0x2e0] sm:$0xff] %v1231_v6  ;;  %v1229_v17 = vmax.f32 %v1197_v9, 0.0  ;;  %v1202_v18 = vadd.f32 %v4014_v7, %v1165_v10  ;;  %v1163_v19 = vmul.f32 %v4009_v5, %v1079_v15 }
 0x123   : > { %1745 = vst [vmem:[%s3741_s21 + $0x2b8] sm:$0xff] %v1713_v63  ;;  %v1643_v11 = vmul.f32 %v4019_v8, %v1549_v4  ;;  %v1711_v13 = vmax.f32 %v1679_v1, 0.0  ;;  %v1682_v14 = vadd.f32 %v4025_v12, %v1645_v3  ;;  %v3165_v22 = vpop.f32.mrf.mxu0 }
 0x124   : > { %v3202_v16 = vpop.f32.mrf.mxu1  ;;  %1261 = vst [vmem:[%s3741_s21 + $0x280] sm:$0xff] %v1229_v17  ;;  %v1234_v25 = vmax.f32 %v1202_v18, 0.0  ;;  %v1200_v26 = vadd.f32 %v4014_v7, %v1163_v19  ;;  %v1166_v28 = vmul.f32 %v3165_v22, %v4009_v5 }
 0x125   : > { %v1680_v20 = vadd.f32 %v4025_v12, %v1643_v11  ;;  %1743 = vst [vmem:[%s3741_s21 + $0x258] sm:$0xff] %v1711_v13  ;;  %v1714_v21 = vmax.f32 %v1682_v14, 0.0  ;;  %v1648_v23 = vmul.f32 %v3202_v16, %v4019_v8  ;;  %v1082_v30 = vpop.f32.mrf.mxu0 }
 0x126   : > { %v1562_v24 = vpop.f32.mrf.mxu1  ;;  %1266 = vst [vmem:[%s3741_s21 + $0x370] sm:$0xff] %v1234_v25  ;;  %v1232_v33 = vmax.f32 %v1200_v26, 0.0  ;;  %v1203_v34 = vadd.f32 %v4014_v7, %v1166_v28  ;;  %v1164_v35 = vmul.f32 %v4009_v5, %v1082_v30 }
 0x127   : > { %v1712_v27 = vmax.f32 %v1680_v20, 0.0  ;;  %1746 = vst [vmem:[%s3741_s21 + $0x2e8] sm:$0xff] %v1714_v21  ;;  %v1685_v29 = vadd.f32 %v4025_v12, %v1648_v23  ;;  %v1646_v31 = vmul.f32 %v4019_v8, %v1562_v24  ;;  %v3168_v39 = vpop.f32.mrf.mxu0 }
 0x128   : > { %v3203_v32 = vpop.f32.mrf.mxu1  ;;  %1264 = vst [vmem:[%s3741_s21 + $0x310] sm:$0xff] %v1232_v33  ;;  %v1235_v41 = vmax.f32 %v1203_v34, 0.0  ;;  %v1201_v42 = vadd.f32 %v4014_v7, %v1164_v35  ;;  %v1169_v43 = vmul.f32 %v3168_v39, %v4009_v5 }
 0x129   : > { %1744 = vst [vmem:[%s3741_s21 + $0x288] sm:$0xff] %v1712_v27  ;;  %v1649_v36 = vmul.f32 %v3203_v32, %v4019_v8  ;;  %v1717_v37 = vmax.f32 %v1685_v29, 0.0  ;;  %v1683_v38 = vadd.f32 %v4025_v12, %v1646_v31  ;;  %v1095_v46 = vpop.f32.mrf.mxu0 }
 0x12a   : > { %v1565_v40 = vpop.f32.mrf.mxu1  ;;  %1267 = vst [vmem:[%s3741_s21 + $0x3a0] sm:$0xff] %v1235_v41  ;;  %v1233_v49 = vmax.f32 %v1201_v42, 0.0  ;;  %v1206_v50 = vadd.f32 %v4014_v7, %v1169_v43  ;;  %v1167_v52 = vmul.f32 %v4009_v5, %v1095_v46 }
 0x12b   : > { %v1686_v44 = vadd.f32 %v4025_v12, %v1649_v36  ;;  %1749 = vst [vmem:[%s3741_s21 + $0x378] sm:$0xff] %v1717_v37  ;;  %v1715_v45 = vmax.f32 %v1683_v38, 0.0  ;;  %v1647_v47 = vmul.f32 %v4019_v8, %v1565_v40  ;;  %v3169_v54 = vpop.f32.mrf.mxu0 }
 0x12c   : > { %v3206_v48 = vpop.f32.mrf.mxu1  ;;  %1265 = vst [vmem:[%s3741_s21 + $0x340] sm:$0xff] %v1233_v49  ;;  %v1238_v57 = vmax.f32 %v1206_v50, 0.0  ;;  %v1204_v58 = vadd.f32 %v4014_v7, %v1167_v52  ;;  %v1170_v59 = vmul.f32 %v3169_v54, %v4009_v5 }
 0x12d   : > { %v1718_v51 = vmax.f32 %v1686_v44, 0.0  ;;  %1747 = vst [vmem:[%s3741_s21 + $0x318] sm:$0xff] %v1715_v45  ;;  %v1684_v53 = vadd.f32 %v4025_v12, %v1647_v47  ;;  %v1652_v55 = vmul.f32 %v3206_v48, %v4019_v8  ;;  %v1098_v63 = vpop.f32.mrf.mxu0 }
 0x12e   : > { %v1578_v56 = vpop.f32.mrf.mxu1  ;;  %1270 = vst [vmem:[%s3741_s21 + $0x430] sm:$0xff] %v1238_v57  ;;  %v1236_v1 = vmax.f32 %v1204_v58, 0.0  ;;  %v1207_v2 = vadd.f32 %v4014_v7, %v1170_v59  ;;  %v1168_v3 = vmul.f32 %v4009_v5, %v1098_v63 }
 0x12f   : > { %1750 = vst [vmem:[%s3741_s21 + $0x3a8] sm:$0xff] %v1718_v51  ;;  %v1650_v60 = vmul.f32 %v4019_v8, %v1578_v56  ;;  %v1716_v61 = vmax.f32 %v1684_v53, 0.0  ;;  %v1689_v62 = vadd.f32 %v4025_v12, %v1652_v55  ;;  %v3172_v9 = vpop.f32.mrf.mxu0 }
 0x130   : > { %v3207_v0 = vpop.f32.mrf.mxu1  ;;  %1268 = vst [vmem:[%s3741_s21 + $0x3d0] sm:$0xff] %v1236_v1  ;;  %v1239_v13 = vmax.f32 %v1207_v2, 0.0  ;;  %v1205_v14 = vadd.f32 %v4014_v7, %v1168_v3  ;;  %v1173_v16 = vmul.f32 %v3172_v9, %v4009_v5 }
 0x131   : > { %v1687_v4 = vadd.f32 %v4025_v12, %v1650_v60  ;;  %1748 = vst [vmem:[%s3741_s21 + $0x348] sm:$0xff] %v1716_v61  ;;  %v1721_v6 = vmax.f32 %v1689_v62, 0.0  ;;  %v1653_v10 = vmul.f32 %v3207_v0, %v4019_v8  ;;  %v1111_v18 = vpop.f32.mrf.mxu0 }
 0x132   : > { %v1581_v11 = vpop.f32.mrf.mxu1  ;;  %1271 = vst [vmem:[%s3741_s21 + $0x460] sm:$0xff] %v1239_v13  ;;  %v1237_v21 = vmax.f32 %v1205_v14, 0.0  ;;  %v1210_v22 = vadd.f32 %v4014_v7, %v1173_v16  ;;  %v1171_v23 = vmul.f32 %v4009_v5, %v1111_v18 }
 0x133   : > { %v1719_v15 = vmax.f32 %v1687_v4, 0.0  ;;  %1753 = vst [vmem:[%s3741_s21 + $0x438] sm:$0xff] %v1721_v6  ;;  %v1690_v17 = vadd.f32 %v4025_v12, %v1653_v10  ;;  %v1651_v19 = vmul.f32 %v4019_v8, %v1581_v11  ;;  %v3173_v27 = vpop.f32.mrf.mxu0  ;;  %v4204_v4 = vld [vmem:[%s4485_s5 + $0x2] ss:$0 sm:$0xff] }
 0x134   : > { %v3210_v20 = vpop.f32.mrf.mxu1  ;;  %1269 = vst [vmem:[%s3741_s21 + $0x400] sm:$0xff] %v1237_v21  ;;  %v1242_v29 = vmax.f32 %v1210_v22, 0.0  ;;  %v1208_v30 = vadd.f32 %v4014_v7, %v1171_v23  ;;  %v1174_v31 = vmul.f32 %v3173_v27, %v4009_v5  ;;  %v4224_v22 = vld [vmem:[%s4485_s5 + $0x3] ss:$0 sm:$0xff] }
 0x135   : > { %1751 = vst [vmem:[%s3741_s21 + $0x3d8] sm:$0xff] %v1719_v15  ;;  %v1656_v24 = vmul.f32 %v3210_v20, %v4019_v8  ;;  %v1722_v25 = vmax.f32 %v1690_v17, 0.0  ;;  %v1688_v26 = vadd.f32 %v4025_v12, %v1651_v19  ;;  %v1114_v34 = vpop.f32.mrf.mxu0  ;;  %v4215_v17 = vld [vmem:[%s4486_s6 + $0x2] ss:$0 sm:$0xff] }
 0x136   : > { %v1594_v28 = vpop.f32.mrf.mxu1  ;;  %1274 = vst [vmem:[%s3741_s21 + $0x4f0] sm:$0xff] %v1242_v29  ;;  %v1240_v37 = vmax.f32 %v1208_v30, 0.0  ;;  %v1211_v38 = vadd.f32 %v4014_v7, %v1174_v31  ;;  %v1172_v40 = vmul.f32 %v4009_v5, %v1114_v34  ;;  %v4234_v30 = vld [vmem:[%s4486_s6 + $0x3] ss:$0 sm:$0xff] }
 0x137   : > { %v1693_v32 = vadd.f32 %v4025_v12, %v1656_v24  ;;  %1754 = vst [vmem:[%s3741_s21 + $0x468] sm:$0xff] %v1722_v25  ;;  %v1720_v33 = vmax.f32 %v1688_v26, 0.0  ;;  %v1654_v35 = vmul.f32 %v4019_v8, %v1594_v28  ;;  %v3176_v42 = vpop.f32.mrf.mxu0 }
 0x138   : > { %v3211_v36 = vpop.f32.mrf.mxu1  ;;  %1272 = vst [vmem:[%s3741_s21 + $0x490] sm:$0xff] %v1240_v37  ;;  %v1243_v45 = vmax.f32 %v1211_v38, 0.0  ;;  %v1209_v46 = vadd.f32 %v4014_v7, %v1172_v40  ;;  %v1177_v47 = vmul.f32 %v3176_v42, %v4009_v5 }
 0x139   : > { %v1725_v39 = vmax.f32 %v1693_v32, 0.0  ;;  %1752 = vst [vmem:[%s3741_s21 + $0x408] sm:$0xff] %v1720_v33  ;;  %v1691_v41 = vadd.f32 %v4025_v12, %v1654_v35  ;;  %v1657_v43 = vmul.f32 %v3211_v36, %v4019_v8  ;;  %v1127_v51 = vpop.f32.mrf.mxu0 }
 0x13a   : > { %v1597_v44 = vpop.f32.mrf.mxu1  ;;  %1275 = vst [vmem:[%s3741_s21 + $0x520] sm:$0xff] %v1243_v45  ;;  %v1241_v53 = vmax.f32 %v1209_v46, 0.0  ;;  %v1214_v54 = vadd.f32 %v4014_v7, %v1177_v47  ;;  %v1175_v55 = vmul.f32 %v4009_v5, %v1127_v51 }
 0x13b   : > { %1757 = vst [vmem:[%s3741_s21 + $0x4f8] sm:$0xff] %v1725_v39  ;;  %v1655_v48 = vmul.f32 %v4019_v8, %v1597_v44  ;;  %v1723_v49 = vmax.f32 %v1691_v41, 0.0  ;;  %v1694_v50 = vadd.f32 %v4025_v12, %v1657_v43  ;;  %v3177_v58 = vpop.f32.mrf.mxu0 }
 0x13c   : > { %v3214_v52 = vpop.f32.mrf.mxu1  ;;  %1273 = vst [vmem:[%s3741_s21 + $0x4c0] sm:$0xff] %v1241_v53  ;;  %v1246_v61 = vmax.f32 %v1214_v54, 0.0  ;;  %v1212_v62 = vadd.f32 %v4014_v7, %v1175_v55  ;;  %v1178_v0 = vmul.f32 %v3177_v58, %v4009_v5 }
 0x13d   : > { %v1692_v56 = vadd.f32 %v4025_v12, %v1655_v48  ;;  %1755 = vst [vmem:[%s3741_s21 + $0x498] sm:$0xff] %v1723_v49  ;;  %v1726_v57 = vmax.f32 %v1694_v50, 0.0  ;;  %v1660_v59 = vmul.f32 %v3214_v52, %v4019_v8  ;;  %v1130_v2 = vpop.f32.mrf.mxu0 }
 0x13e   : > { %v1610_v60 = vpop.f32.mrf.mxu1  ;;  %1278 = vst [vmem:[%s3741_s21 + $0x5b0] sm:$0xff] %v1246_v61  ;;  %v1244_v9 = vmax.f32 %v1212_v62, 0.0  ;;  %v1215_v10 = vadd.f32 %v4014_v7, %v1178_v0  ;;  %v1176_v11 = vmul.f32 %v4009_v5, %v1130_v2 }
 0x13f   : > { %v1724_v63 = vmax.f32 %v1692_v56, 0.0  ;;  %1758 = vst [vmem:[%s3741_s21 + $0x528] sm:$0xff] %v1726_v57  ;;  %v1697_v1 = vadd.f32 %v4025_v12, %v1660_v59  ;;  %v1658_v3 = vmul.f32 %v4019_v8, %v1610_v60  ;;  %v3224_v16 = vpop.f32.mrf.mxu0 }
 0x140   : > { %v3215_v6 = vpop.f32.mrf.mxu1  ;;  %1276 = vst [vmem:[%s3741_s21 + $0x550] sm:$0xff] %v1244_v9  ;;  %v1247_v19 = vmax.f32 %v1215_v10, 0.0  ;;  %v1213_v20 = vadd.f32 %v4014_v7, %v1176_v11  ;;  %v2116_v5 = vmul.f32 %v3224_v16, %v4204_v4 }
 0x141   : > { %1756 = vst [vmem:[%s3741_s21 + $0x4c8] sm:$0xff] %v1724_v63  ;;  %v1661_v13 = vmul.f32 %v3215_v6, %v4019_v8  ;;  %v1729_v14 = vmax.f32 %v1697_v1, 0.0  ;;  %v1695_v15 = vadd.f32 %v4025_v12, %v1658_v3  ;;  %v1982_v24 = vpop.f32.mrf.mxu0 }
 0x142   : > { %v1613_v18 = vpop.f32.mrf.mxu1  ;;  %1279 = vst [vmem:[%s3741_s21 + $0x5e0] sm:$0xff] %v1247_v19  ;;  %v1245_v27 = vmax.f32 %v1213_v20, 0.0  ;;  %v2153_v7 = vadd.f32 %v4215_v17, %v2116_v5  ;;  %v2114_v29 = vmul.f32 %v4204_v4, %v1982_v24 }
 0x143   : > { %v1698_v21 = vadd.f32 %v4025_v12, %v1661_v13  ;;  %1761 = vst [vmem:[%s3741_s21 + $0x5b8] sm:$0xff] %v1729_v14  ;;  %v1727_v23 = vmax.f32 %v1695_v15, 0.0  ;;  %v1659_v25 = vmul.f32 %v4019_v8, %v1613_v18  ;;  %v3225_v32 = vpop.f32.mrf.mxu0 }
 0x144   : > { %v3262_v26 = vpop.f32.mrf.mxu1  ;;  %1277 = vst [vmem:[%s3741_s21 + $0x580] sm:$0xff] %v1245_v27  ;;  %v2185_v34 = vmax.f32 %v2153_v7, 0.0  ;;  %v2151_v35 = vadd.f32 %v4215_v17, %v2114_v29  ;;  %v2117_v36 = vmul.f32 %v3225_v32, %v4204_v4 }
 0x145   : > { %v1730_v28 = vmax.f32 %v1698_v21, 0.0  ;;  %1759 = vst [vmem:[%s3741_s21 + $0x558] sm:$0xff] %v1727_v23  ;;  %v1696_v31 = vadd.f32 %v4025_v12, %v1659_v25  ;;  %v2600_v8 = vmul.f32 %v3262_v26, %v4224_v22  ;;  %v1985_v40 = vpop.f32.mrf.mxu0 }
 0x146   : > { %v2466_v33 = vpop.f32.mrf.mxu1  ;;  %2217 = vst [vmem:[%s3741_s21 + $0x80] sm:$0xff] %v2185_v34  ;;  %v2183_v41 = vmax.f32 %v2151_v35, 0.0  ;;  %v2154_v42 = vadd.f32 %v4215_v17, %v2117_v36  ;;  %v2115_v43 = vmul.f32 %v4204_v4, %v1985_v40 }
 0x147   : > { %1762 = vst [vmem:[%s3741_s21 + $0x5e8] sm:$0xff] %v1730_v28  ;;  %v2598_v37 = vmul.f32 %v4224_v22, %v2466_v33  ;;  %v1728_v38 = vmax.f32 %v1696_v31, 0.0  ;;  %v2637_v39 = vadd.f32 %v4234_v30, %v2600_v8  ;;  %v3228_v46 = vpop.f32.mrf.mxu0 }
 0x148   : > { %v3263_v12 = vpop.f32.mrf.mxu1  ;;  %2215 = vst [vmem:[%s3741_s21 + $0x20] sm:$0xff] %v2183_v41  ;;  %v2186_v49 = vmax.f32 %v2154_v42, 0.0  ;;  %v2152_v50 = vadd.f32 %v4215_v17, %v2115_v43  ;;  %v2120_v52 = vmul.f32 %v3228_v46, %v4204_v4 }
 0x149   : > { %v2635_v44 = vadd.f32 %v4234_v30, %v2598_v37  ;;  %1760 = vst [vmem:[%s3741_s21 + $0x588] sm:$0xff] %v1728_v38  ;;  %v2669_v45 = vmax.f32 %v2637_v39, 0.0  ;;  %v2601_v47 = vmul.f32 %v3263_v12, %v4224_v22  ;;  %v1998_v54 = vpop.f32.mrf.mxu0 }
 0x14a   : > { %v2469_v48 = vpop.f32.mrf.mxu1  ;;  %2218 = vst [vmem:[%s3741_s21 + $0xb0] sm:$0xff] %v2186_v49  ;;  %v2184_v57 = vmax.f32 %v2152_v50, 0.0  ;;  %v2157_v58 = vadd.f32 %v4215_v17, %v2120_v52  ;;  %v2118_v59 = vmul.f32 %v4204_v4, %v1998_v54 }
 0x14b   : > { %v2667_v51 = vmax.f32 %v2635_v44, 0.0  ;;  %2701 = vst [vmem:[%s3741_s21 + $0x88] sm:$0xff] %v2669_v45  ;;  %v2638_v53 = vadd.f32 %v4234_v30, %v2601_v47  ;;  %v2599_v55 = vmul.f32 %v4224_v22, %v2469_v48  ;;  %v3229_v63 = vpop.f32.mrf.mxu0 }
 0x14c   : > { %v3266_v56 = vpop.f32.mrf.mxu1  ;;  %2216 = vst [vmem:[%s3741_s21 + $0x50] sm:$0xff] %v2184_v57  ;;  %v2189_v1 = vmax.f32 %v2157_v58, 0.0  ;;  %v2155_v2 = vadd.f32 %v4215_v17, %v2118_v59  ;;  %v2121_v3 = vmul.f32 %v3229_v63, %v4204_v4 }
 0x14d   : > { %2699 = vst [vmem:[%s3741_s21 + $0x28] sm:$0xff] %v2667_v51  ;;  %v2604_v60 = vmul.f32 %v3266_v56, %v4224_v22  ;;  %v2670_v61 = vmax.f32 %v2638_v53, 0.0  ;;  %v2636_v62 = vadd.f32 %v4234_v30, %v2599_v55  ;;  %v2001_v10 = vpop.f32.mrf.mxu0 }
 0x14e   : > { %v2482_v0 = vpop.f32.mrf.mxu1  ;;  %2221 = vst [vmem:[%s3741_s21 + $0x140] sm:$0xff] %v2189_v1  ;;  %v2187_v14 = vmax.f32 %v2155_v2, 0.0  ;;  %v2158_v15 = vadd.f32 %v4215_v17, %v2121_v3  ;;  %v2119_v18 = vmul.f32 %v4204_v4, %v2001_v10 }
 0x14f   : > { %v2641_v6 = vadd.f32 %v4234_v30, %v2604_v60  ;;  %2702 = vst [vmem:[%s3741_s21 + $0xb8] sm:$0xff] %v2670_v61  ;;  %v2668_v9 = vmax.f32 %v2636_v62, 0.0  ;;  %v2602_v11 = vmul.f32 %v4224_v22, %v2482_v0  ;;  %v3232_v20 = vpop.f32.mrf.mxu0 }
 0x150   : > { %v3267_v13 = vpop.f32.mrf.mxu1  ;;  %2219 = vst [vmem:[%s3741_s21 + $0xe0] sm:$0xff] %v2187_v14  ;;  %v2190_v23 = vmax.f32 %v2158_v15, 0.0  ;;  %v2156_v24 = vadd.f32 %v4215_v17, %v2119_v18  ;;  %v2124_v25 = vmul.f32 %v3232_v20, %v4204_v4 }
 0x151   : > { %v2673_v16 = vmax.f32 %v2641_v6, 0.0  ;;  %2700 = vst [vmem:[%s3741_s21 + $0x58] sm:$0xff] %v2668_v9  ;;  %v2639_v19 = vadd.f32 %v4234_v30, %v2602_v11  ;;  %v2605_v5 = vmul.f32 %v3267_v13, %v4224_v22  ;;  %v2014_v28 = vpop.f32.mrf.mxu0 }
 0x152   : > { %v2485_v21 = vpop.f32.mrf.mxu1  ;;  %2222 = vst [vmem:[%s3741_s21 + $0x170] sm:$0xff] %v2190_v23  ;;  %v2188_v31 = vmax.f32 %v2156_v24, 0.0  ;;  %v2161_v32 = vadd.f32 %v4215_v17, %v2124_v25  ;;  %v2122_v8 = vmul.f32 %v4204_v4, %v2014_v28 }
 0x153   : > { %2705 = vst [vmem:[%s3741_s21 + $0x148] sm:$0xff] %v2673_v16  ;;  %v2603_v26 = vmul.f32 %v4224_v22, %v2485_v21  ;;  %v2671_v27 = vmax.f32 %v2639_v19, 0.0  ;;  %v2642_v7 = vadd.f32 %v4234_v30, %v2605_v5  ;;  %v3233_v35 = vpop.f32.mrf.mxu0 }
 0x154   : > { %v3270_v29 = vpop.f32.mrf.mxu1  ;;  %2220 = vst [vmem:[%s3741_s21 + $0x110] sm:$0xff] %v2188_v31  ;;  %v2193_v38 = vmax.f32 %v2161_v32, 0.0  ;;  %v2159_v39 = vadd.f32 %v4215_v17, %v2122_v8  ;;  %v2125_v12 = vmul.f32 %v3233_v35, %v4204_v4 }
 0x155   : > { %v2640_v33 = vadd.f32 %v4234_v30, %v2603_v26  ;;  %2703 = vst [vmem:[%s3741_s21 + $0xe8] sm:$0xff] %v2671_v27  ;;  %v2674_v34 = vmax.f32 %v2642_v7, 0.0  ;;  %v2608_v36 = vmul.f32 %v3270_v29, %v4224_v22  ;;  %v2017_v42 = vpop.f32.mrf.mxu0 }
 0x156   : > { %v2498_v37 = vpop.f32.mrf.mxu1  ;;  %2225 = vst [vmem:[%s3741_s21 + $0x200] sm:$0xff] %v2193_v38  ;;  %v2191_v45 = vmax.f32 %v2159_v39, 0.0  ;;  %v2162_v46 = vadd.f32 %v4215_v17, %v2125_v12  ;;  %v2123_v47 = vmul.f32 %v4204_v4, %v2017_v42 }
 0x157   : > { %v2672_v40 = vmax.f32 %v2640_v33, 0.0  ;;  %2706 = vst [vmem:[%s3741_s21 + $0x178] sm:$0xff] %v2674_v34  ;;  %v2645_v41 = vadd.f32 %v4234_v30, %v2608_v36  ;;  %v2606_v43 = vmul.f32 %v4224_v22, %v2498_v37  ;;  %v3236_v51 = vpop.f32.mrf.mxu0 }
 0x158   : > { %v3271_v44 = vpop.f32.mrf.mxu1  ;;  %2223 = vst [vmem:[%s3741_s21 + $0x1a0] sm:$0xff] %v2191_v45  ;;  %v2194_v53 = vmax.f32 %v2162_v46, 0.0  ;;  %v2160_v54 = vadd.f32 %v4215_v17, %v2123_v47  ;;  %v2128_v55 = vmul.f32 %v3236_v51, %v4204_v4 }
 0x159   : > { %2704 = vst [vmem:[%s3741_s21 + $0x118] sm:$0xff] %v2672_v40  ;;  %v2609_v48 = vmul.f32 %v3271_v44, %v4224_v22  ;;  %v2677_v49 = vmax.f32 %v2645_v41, 0.0  ;;  %v2643_v50 = vadd.f32 %v4234_v30, %v2606_v43  ;;  %v2030_v58 = vpop.f32.mrf.mxu0 }
 0x15a   : > { %v2501_v52 = vpop.f32.mrf.mxu1  ;;  %2226 = vst [vmem:[%s3741_s21 + $0x230] sm:$0xff] %v2194_v53  ;;  %v2192_v61 = vmax.f32 %v2160_v54, 0.0  ;;  %v2165_v62 = vadd.f32 %v4215_v17, %v2128_v55  ;;  %v2126_v0 = vmul.f32 %v4204_v4, %v2030_v58 }
 0x15b   : > { %v2646_v56 = vadd.f32 %v4234_v30, %v2609_v48  ;;  %2709 = vst [vmem:[%s3741_s21 + $0x208] sm:$0xff] %v2677_v49  ;;  %v2675_v57 = vmax.f32 %v2643_v50, 0.0  ;;  %v2607_v59 = vmul.f32 %v4224_v22, %v2501_v52  ;;  %v3237_v2 = vpop.f32.mrf.mxu0 }
 0x15c   : > { %v3274_v60 = vpop.f32.mrf.mxu1  ;;  %2224 = vst [vmem:[%s3741_s21 + $0x1d0] sm:$0xff] %v2192_v61  ;;  %v2197_v9 = vmax.f32 %v2165_v62, 0.0  ;;  %v2163_v10 = vadd.f32 %v4215_v17, %v2126_v0  ;;  %v2129_v11 = vmul.f32 %v3237_v2, %v4204_v4 }
 0x15d   : > { %v2678_v63 = vmax.f32 %v2646_v56, 0.0  ;;  %2707 = vst [vmem:[%s3741_s21 + $0x1a8] sm:$0xff] %v2675_v57  ;;  %v2644_v1 = vadd.f32 %v4234_v30, %v2607_v59  ;;  %v2612_v3 = vmul.f32 %v3274_v60, %v4224_v22  ;;  %v2033_v16 = vpop.f32.mrf.mxu0 }
 0x15e   : > { %v2514_v6 = vpop.f32.mrf.mxu1  ;;  %2229 = vst [vmem:[%s3741_s21 + $0x2c0] sm:$0xff] %v2197_v9  ;;  %v2195_v19 = vmax.f32 %v2163_v10, 0.0  ;;  %v2166_v20 = vadd.f32 %v4215_v17, %v2129_v11  ;;  %v2127_v5 = vmul.f32 %v4204_v4, %v2033_v16 }
 0x15f   : > { %2710 = vst [vmem:[%s3741_s21 + $0x238] sm:$0xff] %v2678_v63  ;;  %v2610_v13 = vmul.f32 %v4224_v22, %v2514_v6  ;;  %v2676_v14 = vmax.f32 %v2644_v1, 0.0  ;;  %v2649_v15 = vadd.f32 %v4234_v30, %v2612_v3  ;;  %v3240_v24 = vpop.f32.mrf.mxu0 }
 0x160   : > { %v3275_v18 = vpop.f32.mrf.mxu1  ;;  %2227 = vst [vmem:[%s3741_s21 + $0x260] sm:$0xff] %v2195_v19  ;;  %v2198_v27 = vmax.f32 %v2166_v20, 0.0  ;;  %v2164_v7 = vadd.f32 %v4215_v17, %v2127_v5  ;;  %v2132_v29 = vmul.f32 %v3240_v24, %v4204_v4 }
 0x161   : > { %v2647_v21 = vadd.f32 %v4234_v30, %v2610_v13  ;;  %2708 = vst [vmem:[%s3741_s21 + $0x1d8] sm:$0xff] %v2676_v14  ;;  %v2681_v23 = vmax.f32 %v2649_v15, 0.0  ;;  %v2613_v25 = vmul.f32 %v3275_v18, %v4224_v22  ;;  %v2046_v32 = vpop.f32.mrf.mxu0 }
 0x162   : > { %v2517_v26 = vpop.f32.mrf.mxu1  ;;  %2230 = vst [vmem:[%s3741_s21 + $0x2f0] sm:$0xff] %v2198_v27  ;;  %v2196_v34 = vmax.f32 %v2164_v7, 0.0  ;;  %v2169_v35 = vadd.f32 %v4215_v17, %v2132_v29  ;;  %v2130_v36 = vmul.f32 %v4204_v4, %v2046_v32 }
 0x163   : > { %v2679_v28 = vmax.f32 %v2647_v21, 0.0  ;;  %2713 = vst [vmem:[%s3741_s21 + $0x2c8] sm:$0xff] %v2681_v23  ;;  %v2650_v31 = vadd.f32 %v4234_v30, %v2613_v25  ;;  %v2611_v8 = vmul.f32 %v4224_v22, %v2517_v26  ;;  %v3241_v40 = vpop.f32.mrf.mxu0 }
 0x164   : > { %v3278_v33 = vpop.f32.mrf.mxu1  ;;  %2228 = vst [vmem:[%s3741_s21 + $0x290] sm:$0xff] %v2196_v34  ;;  %v2201_v41 = vmax.f32 %v2169_v35, 0.0  ;;  %v2167_v42 = vadd.f32 %v4215_v17, %v2130_v36  ;;  %v2133_v43 = vmul.f32 %v3241_v40, %v4204_v4 }
 0x165   : > { %2711 = vst [vmem:[%s3741_s21 + $0x268] sm:$0xff] %v2679_v28  ;;  %v2616_v37 = vmul.f32 %v3278_v33, %v4224_v22  ;;  %v2682_v38 = vmax.f32 %v2650_v31, 0.0  ;;  %v2648_v39 = vadd.f32 %v4234_v30, %v2611_v8  ;;  %v2049_v46 = vpop.f32.mrf.mxu0 }
 0x166   : > { %v2530_v12 = vpop.f32.mrf.mxu1  ;;  %2233 = vst [vmem:[%s3741_s21 + $0x380] sm:$0xff] %v2201_v41  ;;  %v2199_v49 = vmax.f32 %v2167_v42, 0.0  ;;  %v2170_v50 = vadd.f32 %v4215_v17, %v2133_v43  ;;  %v2131_v52 = vmul.f32 %v4204_v4, %v2049_v46 }
 0x167   : > { %v2653_v44 = vadd.f32 %v4234_v30, %v2616_v37  ;;  %2714 = vst [vmem:[%s3741_s21 + $0x2f8] sm:$0xff] %v2682_v38  ;;  %v2680_v45 = vmax.f32 %v2648_v39, 0.0  ;;  %v2614_v47 = vmul.f32 %v4224_v22, %v2530_v12  ;;  %v3244_v54 = vpop.f32.mrf.mxu0 }
 0x168   : > { %v3279_v48 = vpop.f32.mrf.mxu1  ;;  %2231 = vst [vmem:[%s3741_s21 + $0x320] sm:$0xff] %v2199_v49  ;;  %v2202_v57 = vmax.f32 %v2170_v50, 0.0  ;;  %v2168_v58 = vadd.f32 %v4215_v17, %v2131_v52  ;;  %v2136_v59 = vmul.f32 %v3244_v54, %v4204_v4 }
 0x169   : > { %v2685_v51 = vmax.f32 %v2653_v44, 0.0  ;;  %2712 = vst [vmem:[%s3741_s21 + $0x298] sm:$0xff] %v2680_v45  ;;  %v2651_v53 = vadd.f32 %v4234_v30, %v2614_v47  ;;  %v2617_v55 = vmul.f32 %v3279_v48, %v4224_v22  ;;  %v2062_v63 = vpop.f32.mrf.mxu0 }
 0x16a   : > { %v2533_v56 = vpop.f32.mrf.mxu1  ;;  %2234 = vst [vmem:[%s3741_s21 + $0x3b0] sm:$0xff] %v2202_v57  ;;  %v2200_v1 = vmax.f32 %v2168_v58, 0.0  ;;  %v2173_v2 = vadd.f32 %v4215_v17, %v2136_v59  ;;  %v2134_v3 = vmul.f32 %v4204_v4, %v2062_v63 }
 0x16b   : > { %2717 = vst [vmem:[%s3741_s21 + $0x388] sm:$0xff] %v2685_v51  ;;  %v2615_v60 = vmul.f32 %v4224_v22, %v2533_v56  ;;  %v2683_v61 = vmax.f32 %v2651_v53, 0.0  ;;  %v2654_v62 = vadd.f32 %v4234_v30, %v2617_v55  ;;  %v3245_v10 = vpop.f32.mrf.mxu0 }
 0x16c   : > { %v3282_v0 = vpop.f32.mrf.mxu1  ;;  %2232 = vst [vmem:[%s3741_s21 + $0x350] sm:$0xff] %v2200_v1  ;;  %v2205_v14 = vmax.f32 %v2173_v2, 0.0  ;;  %v2171_v15 = vadd.f32 %v4215_v17, %v2134_v3  ;;  %v2137_v18 = vmul.f32 %v3245_v10, %v4204_v4 }
 0x16d   : > { %v2652_v6 = vadd.f32 %v4234_v30, %v2615_v60  ;;  %2715 = vst [vmem:[%s3741_s21 + $0x328] sm:$0xff] %v2683_v61  ;;  %v2686_v9 = vmax.f32 %v2654_v62, 0.0  ;;  %v2620_v11 = vmul.f32 %v3282_v0, %v4224_v22  ;;  %v2065_v20 = vpop.f32.mrf.mxu0 }
 0x16e   : > { %v2546_v13 = vpop.f32.mrf.mxu1  ;;  %2237 = vst [vmem:[%s3741_s21 + $0x440] sm:$0xff] %v2205_v14  ;;  %v2203_v23 = vmax.f32 %v2171_v15, 0.0  ;;  %v2174_v24 = vadd.f32 %v4215_v17, %v2137_v18  ;;  %v2135_v25 = vmul.f32 %v4204_v4, %v2065_v20 }
 0x16f   : > { %v2684_v16 = vmax.f32 %v2652_v6, 0.0  ;;  %2718 = vst [vmem:[%s3741_s21 + $0x3b8] sm:$0xff] %v2686_v9  ;;  %v2657_v19 = vadd.f32 %v4234_v30, %v2620_v11  ;;  %v2618_v5 = vmul.f32 %v4224_v22, %v2546_v13  ;;  %v3248_v28 = vpop.f32.mrf.mxu0 }
 0x170   : > { %v3283_v21 = vpop.f32.mrf.mxu1  ;;  %2235 = vst [vmem:[%s3741_s21 + $0x3e0] sm:$0xff] %v2203_v23  ;;  %v2206_v31 = vmax.f32 %v2174_v24, 0.0  ;;  %v2172_v32 = vadd.f32 %v4215_v17, %v2135_v25  ;;  %v2140_v8 = vmul.f32 %v3248_v28, %v4204_v4 }
 0x171   : > { %2716 = vst [vmem:[%s3741_s21 + $0x358] sm:$0xff] %v2684_v16  ;;  %v2621_v26 = vmul.f32 %v3283_v21, %v4224_v22  ;;  %v2689_v27 = vmax.f32 %v2657_v19, 0.0  ;;  %v2655_v7 = vadd.f32 %v4234_v30, %v2618_v5  ;;  %v2078_v35 = vpop.f32.mrf.mxu0 }
 0x172   : > { %v2549_v29 = vpop.f32.mrf.mxu1  ;;  %2238 = vst [vmem:[%s3741_s21 + $0x470] sm:$0xff] %v2206_v31  ;;  %v2204_v38 = vmax.f32 %v2172_v32, 0.0  ;;  %v2177_v39 = vadd.f32 %v4215_v17, %v2140_v8  ;;  %v2138_v12 = vmul.f32 %v4204_v4, %v2078_v35 }
 0x173   : > { %v2658_v33 = vadd.f32 %v4234_v30, %v2621_v26  ;;  %2721 = vst [vmem:[%s3741_s21 + $0x448] sm:$0xff] %v2689_v27  ;;  %v2687_v34 = vmax.f32 %v2655_v7, 0.0  ;;  %v2619_v36 = vmul.f32 %v4224_v22, %v2549_v29  ;;  %v3249_v42 = vpop.f32.mrf.mxu0 }
 0x174   : > { %v3286_v37 = vpop.f32.mrf.mxu1  ;;  %2236 = vst [vmem:[%s3741_s21 + $0x410] sm:$0xff] %v2204_v38  ;;  %v2209_v45 = vmax.f32 %v2177_v39, 0.0  ;;  %v2175_v46 = vadd.f32 %v4215_v17, %v2138_v12  ;;  %v2141_v47 = vmul.f32 %v3249_v42, %v4204_v4 }
 0x175   : > { %v2690_v40 = vmax.f32 %v2658_v33, 0.0  ;;  %2719 = vst [vmem:[%s3741_s21 + $0x3e8] sm:$0xff] %v2687_v34  ;;  %v2656_v41 = vadd.f32 %v4234_v30, %v2619_v36  ;;  %v2624_v43 = vmul.f32 %v3286_v37, %v4224_v22  ;;  %v2081_v51 = vpop.f32.mrf.mxu0 }
 0x176   : > { %v2562_v44 = vpop.f32.mrf.mxu1  ;;  %2241 = vst [vmem:[%s3741_s21 + $0x500] sm:$0xff] %v2209_v45  ;;  %v2207_v53 = vmax.f32 %v2175_v46, 0.0  ;;  %v2178_v54 = vadd.f32 %v4215_v17, %v2141_v47  ;;  %v2139_v55 = vmul.f32 %v4204_v4, %v2081_v51 }
 0x177   : > { %2722 = vst [vmem:[%s3741_s21 + $0x478] sm:$0xff] %v2690_v40  ;;  %v2622_v48 = vmul.f32 %v4224_v22, %v2562_v44  ;;  %v2688_v49 = vmax.f32 %v2656_v41, 0.0  ;;  %v2661_v50 = vadd.f32 %v4234_v30, %v2624_v43  ;;  %v3252_v58 = vpop.f32.mrf.mxu0 }
 0x178   : > { %v3287_v52 = vpop.f32.mrf.mxu1  ;;  %2239 = vst [vmem:[%s3741_s21 + $0x4a0] sm:$0xff] %v2207_v53  ;;  %v2210_v61 = vmax.f32 %v2178_v54, 0.0  ;;  %v2176_v62 = vadd.f32 %v4215_v17, %v2139_v55  ;;  %v2144_v0 = vmul.f32 %v3252_v58, %v4204_v4 }
 0x179   : > { %v2659_v56 = vadd.f32 %v4234_v30, %v2622_v48  ;;  %2720 = vst [vmem:[%s3741_s21 + $0x418] sm:$0xff] %v2688_v49  ;;  %v2693_v57 = vmax.f32 %v2661_v50, 0.0  ;;  %v2625_v59 = vmul.f32 %v3287_v52, %v4224_v22  ;;  %v2094_v2 = vpop.f32.mrf.mxu0 }
 0x17a   : > { %v2565_v60 = vpop.f32.mrf.mxu1  ;;  %2242 = vst [vmem:[%s3741_s21 + $0x530] sm:$0xff] %v2210_v61  ;;  %v2208_v9 = vmax.f32 %v2176_v62, 0.0  ;;  %v2181_v10 = vadd.f32 %v4215_v17, %v2144_v0  ;;  %v2142_v11 = vmul.f32 %v4204_v4, %v2094_v2 }
 0x17b   : > { %v2691_v63 = vmax.f32 %v2659_v56, 0.0  ;;  %2725 = vst [vmem:[%s3741_s21 + $0x508] sm:$0xff] %v2693_v57  ;;  %v2662_v1 = vadd.f32 %v4234_v30, %v2625_v59  ;;  %v2623_v3 = vmul.f32 %v4224_v22, %v2565_v60  ;;  %v3253_v16 = vpop.f32.mrf.mxu0 }
 0x17c   : > { %v3290_v6 = vpop.f32.mrf.mxu1  ;;  %2240 = vst [vmem:[%s3741_s21 + $0x4d0] sm:$0xff] %v2208_v9  ;;  %v2213_v19 = vmax.f32 %v2181_v10, 0.0  ;;  %v2179_v20 = vadd.f32 %v4215_v17, %v2142_v11  ;;  %v2145_v5 = vmul.f32 %v3253_v16, %v4204_v4 }
 0x17d   : > { %2723 = vst [vmem:[%s3741_s21 + $0x4a8] sm:$0xff] %v2691_v63  ;;  %v2628_v13 = vmul.f32 %v3290_v6, %v4224_v22  ;;  %v2694_v14 = vmax.f32 %v2662_v1, 0.0  ;;  %v2660_v15 = vadd.f32 %v4234_v30, %v2623_v3  ;;  %v2097_v24 = vpop.f32.mrf.mxu0 }
 0x17e   : > { %v2578_v18 = vpop.f32.mrf.mxu1  ;;  %2245 = vst [vmem:[%s3741_s21 + $0x5c0] sm:$0xff] %v2213_v19  ;;  %v2211_v27 = vmax.f32 %v2179_v20, 0.0  ;;  %v2182_v7 = vadd.f32 %v4215_v17, %v2145_v5  ;;  %v2143_v29 = vmul.f32 %v4204_v4, %v2097_v24 }
 0x17f   : > { %v2665_v21 = vadd.f32 %v4234_v30, %v2628_v13  ;;  %2726 = vst [vmem:[%s3741_s21 + $0x538] sm:$0xff] %v2694_v14  ;;  %v2692_v23 = vmax.f32 %v2660_v15, 0.0  ;;  %v2626_v25 = vmul.f32 %v4224_v22, %v2578_v18 }
 0x180   : > { %v3291_v26 = vpop.f32.mrf.mxu1  ;;  %2243 = vst [vmem:[%s3741_s21 + $0x560] sm:$0xff] %v2211_v27  ;;  %v2214_v33 = vmax.f32 %v2182_v7, 0.0  ;;  %v2180_v34 = vadd.f32 %v4215_v17, %v2143_v29 }
 0x181   : > { %v2697_v28 = vmax.f32 %v2665_v21, 0.0  ;;  %2724 = vst [vmem:[%s3741_s21 + $0x4d8] sm:$0xff] %v2692_v23  ;;  %v2663_v31 = vadd.f32 %v4234_v30, %v2626_v25  ;;  %v2629_v32 = vmul.f32 %v3291_v26, %v4224_v22 }
 0x182   : > { %v2581_v8 = vpop.f32.mrf.mxu1  ;;  %2246 = vst [vmem:[%s3741_s21 + $0x5f0] sm:$0xff] %v2214_v33  ;;  %v2212_v37 = vmax.f32 %v2180_v34, 0.0 }
 0x183   : > { %2729 = vst [vmem:[%s3741_s21 + $0x5c8] sm:$0xff] %v2697_v28  ;;  %v2627_v35 = vmul.f32 %v4224_v22, %v2581_v8  ;;  %v2695_v4 = vmax.f32 %v2663_v31, 0.0  ;;  %v2666_v36 = vadd.f32 %v4234_v30, %v2629_v32 }
 0x184   : > { %2244 = vst [vmem:[%s3741_s21 + $0x590] sm:$0xff] %v2212_v37 }
 0x185   : > { %v2664_v38 = vadd.f32 %v4234_v30, %v2627_v35  ;;  %2727 = vst [vmem:[%s3741_s21 + $0x568] sm:$0xff] %v2695_v4  ;;  %v2698_v39 = vmax.f32 %v2666_v36, 0.0 }
 0x187   : > { %v2696_v17 = vmax.f32 %v2664_v38, 0.0  ;;  %2730 = vst [vmem:[%s3741_s21 + $0x5f8] sm:$0xff] %v2698_v39 }
 0x189   : > { %2728 = vst [vmem:[%s3741_s21 + $0x598] sm:$0xff] %v2696_v17 }
 0x18a   : > { %3427 = shalt.err (!%p3424_p7)
}
 0x18b   : > { %s3428_s21 = scalar_lea.hbm %s4435_s22, 24576  ;;  %s3432_s18 = scalar_lea.hbm %s4487_s7, 49152 }
 0x18c   : > { %p3429_p10 = scmp.ne.s32.totalorder %s4435_s22, %s3428_s21  ;;  %p3433_p13 = scmp.lt.s32.totalorder %s4435_s22, %s4487_s7 }
 0x18d   : > { %p3434_p0 = scmp.lt.s32.totalorder %s3432_s18, %s3428_s21 }
 0x18e   : > { %p3430_p11 = pnand %p3429_p10, %p3558_p6 }
 0x18f   : > { %p3435_p1 = por %p3434_p0, %p3433_p13 }
 0x190   : > { %p3431_p12 = pneg %p3430_p11 }
 0x192   : > { %p3436_p2 = pnand %p3435_p1, %p3431_p12 }
 0x194   : > { %3439 = shalt.err (!%p3436_p2)
}
 0x195   : > { %s3477_s28 = smov 768   ;;  %s3478_s29 = smov 48  }
 0x196   : > { %3300 = dma.vmem_to_hbm [thread:$0]  (%p3558_p6), %s4429_s16, 24576, %s4435_s22, %s2732_s23, %s3477_s28, %s3477_s28, %s3478_s29  }
 0x197 PF: > { %s2760_s8 = sand.u32 1, %s3462_s24   ;;  %p3303_p3 = pnand %p2839_p9, %p3562_p8 }
 0x198   : > { %s2761_s15 = scalar_lea.sflag [#allocation4], %s2760_s8 }
 0x199   : > { %p3304_p4 = pneg %p3303_p3 }
 0x19b   : > { %3457 = dma.done.wait (%p3304_p4), %s2761_s15, 24576  }
 0x19c   : > { %3459 = vsyncadd (%p3304_p4), %s2761_s15, 4294942720  ;;  %p17_p5 = scmp.ge.s32.totalorder %s3544_s30, 4   ;;  %s4490_s24 = smov %s3466_s25 }
 0x19d   : > { %s4491_s25 = smov %s3470_s26  ;;  %s4492_s26 = smov %s3556_s10 }
 0x19e   : > { %s4493_s27 = smov %s3544_s30  ;;  %19 = sbr.rel (!%p17_p5) target bundleno = 3 (0x3), region = 139 }
 0x1a3   :  { %2766 = vsyncpa [#allocation4], 1 }
 0x1a4   :  { %2768 = vsyncpa [#allocation4 + $0x1], 1 }

</bundles_post_ra>
